<compile_context>
chip_gen: v7x
topology: tpu7x:2x2x1
jax: 0.10.0
libtpu: 0.0.40
codegen_flags: <defaults>
</compile_context>

<pallas_src>
import jax
import jax.numpy as jnp
import numpy as np
from jax import lax
from jax.experimental import pallas as pl
from jax.experimental.pallas import tpu as pltpu


# ---------------------------------------------------------------------------
# Fused kernel: one invocation processes bb images, everything VMEM-resident.
# Layout: activations are (C, L) f32 slabs where L = bb*P lanes; image i's
# zero-ring-padded (H+2)x(W+2) frame sits row-major at lanes [i*P, i*P+npix).
# The scratch `buf` carries an extra `mrg`-lane guard on both sides so every
# 3x3 / pooling tap is a static lane-offset slice; interior taps never cross
# an image slot, so garbage in guards/rings can never reach interior outputs.
# ---------------------------------------------------------------------------
def unet_kernel(x_ref, m_ref, w1_ref, b1_ref, w2_ref, b2_ref,
                wd_ref, bd_ref, w3_ref, b3_ref, o_ref, buf):
    L = o_ref.shape[1]                   # bb * P  (slab lanes, multiple of 128)
    mrg = (x_ref.shape[1] - L) // 2      # lane guard each side (= W+3)
    wp = mrg - 1                         # padded-frame row width (W+2)
    C = w2_ref.shape[0]                  # channels (8)

    interior = m_ref[0:1, :] != 0.0      # 1 inside the HxW image
    iev = m_ref[1:2, :] != 0.0           # pixel-row parity (i % 2 == 0)
    jev = m_ref[2:3, :] != 0.0           # pixel-col parity (j % 2 == 0)

    # Clear only the two guard strips (the [mrg, mrg+L) slab is fully
    # overwritten below).  Unconditional so it is correct per-core under
    # megacore grid sharding; it is 2 tiny (C, mrg) stores.
    buf[:, 0:mrg] = jnp.zeros((C, mrg), jnp.float32)
    buf[:, mrg + L:mrg + L + mrg] = jnp.zeros((C, mrg), jnp.float32)

    offs = [(di - 1) * wp + (dj - 1) for di in range(3) for dj in range(3)]

    # --- Conv2d(1, 8, 3, padding=1) + ReLU : one (8,9)@(9,L) matmul ---------
    xtaps = jnp.concatenate([x_ref[:, mrg + d:mrg + d + L] for d in offs], axis=0)
    h1 = jnp.maximum(jnp.dot(w1_ref[...], xtaps,
                             preferred_element_type=jnp.float32) + b1_ref[...], 0.0)
    # zero ring/slack so it acts as conv2's zero padding
    buf[:, mrg:mrg + L] = jnp.where(interior, h1, 0.0)

    # --- Conv2d(8, 8, 3, padding=1) + ReLU : in-VMEM im2col, one matmul -----
    taps = jnp.concatenate([buf[:, mrg + d:mrg + d + L] for d in offs], axis=0)
    h2 = jnp.maximum(jnp.dot(w2_ref[...], taps,
                             preferred_element_type=jnp.float32) + b2_ref[...], 0.0)

    # --- MaxPool2d(2): shifted max + parity vselect, block max broadcast ----
    # h2/colmax stay register-resident; only shifted neighbours re-read buf.
    # (pltpu.roll would avoid the two stores entirely; kept buf slices for
    #  guaranteed lowering.)
    buf[:, mrg:mrg + L] = h2
    cp = buf[:, mrg + 1:mrg + 1 + L]
    cm = buf[:, mrg - 1:mrg - 1 + L]
    colmax = jnp.where(jev, jnp.maximum(h2, cp), jnp.maximum(cm, h2))
    buf[:, mrg:mrg + L] = colmax
    rp = buf[:, mrg + wp:mrg + wp + L]
    rm = buf[:, mrg - wp:mrg - wp + L]
    pooled = jnp.where(iev, jnp.maximum(colmax, rp), jnp.maximum(rm, colmax))

    # --- ConvTranspose2d(8,8,2,s=2)+ReLU as ONE (32,8) matmul, Conv1x1 as a
    #     block-diagonal (4,32) matmul, 3-vselect parity pick, sigmoid -------
    up = jnp.maximum(jnp.dot(wd_ref[...], pooled,
                             preferred_element_type=jnp.float32) + bd_ref[...], 0.0)
    z4 = jnp.dot(w3_ref[...], up, preferred_element_type=jnp.float32)   # (4, L)
    sel = jnp.where(iev,
                    jnp.where(jev, z4[0:1], z4[1:2]),
                    jnp.where(jev, z4[2:3], z4[3:4]))
    z = jnp.where(interior, sel, 0.0) + b3_ref[0, 0]
    # sigmoid via EUP tanh (no VALU divide); one dense (1, L) store, L%128==0
    o_ref[...] = 0.5 * jnp.tanh(0.5 * z) + 0.5


# ---------------------------------------------------------------------------
# Wrapper: layout glue (pad + flatten input, reshape weights, final crop).
# ---------------------------------------------------------------------------
@jax.jit
def unet_forward(x, params):
    """x: (B, 1, H, W) NCHW float32 -> (B, 1, H, W)."""
    w1, b1, w2, b2, wd, bd, w3, b3 = params
    B, cin, H, W = x.shape
    assert cin == 1
    assert H % 2 == 0 and W % 2 == 0, "pooling/parity scheme assumes even H, W"
    C = w1.shape[0]                        # 8
    hp, wp = H + 2, W + 2                  # padded frame
    npix = hp * wp
    P = ((npix + 127) // 128) * 128        # per-image lane slot, 128-aligned
    mrg = wp + 1                           # lane guard >= max tap offset
    bb = min(B, 8)                         # images per grid step (batch blocking)
    nsteps = -(-B // bb)
    B_pad = nsteps * bb
    L = bb * P                             # slab lanes per step (mult of 128)
    xw = L + 2 * mrg

    # input -> per-step flat slab with lane guards: (nsteps, 1, L + 2*mrg)
    x0 = x[:, 0]
    if B_pad > B:
        x0 = jnp.pad(x0, ((0, B_pad - B), (0, 0), (0, 0)))
    xf = jnp.pad(x0, ((0, 0), (1, 1), (1, 1))).reshape(B_pad, npix)
    xf = jnp.pad(xf, ((0, 0), (0, P - npix))).reshape(nsteps, bb * P)
    xf = jnp.pad(xf, ((0, 0), (mrg, mrg)))[:, None, :]

    # interior / parity masks, one slot tiled bb times: (3, L)
    rr, cc = jnp.meshgrid(jnp.arange(hp), jnp.arange(wp), indexing="ij")
    interior = (rr >= 1) & (rr <= H) & (cc >= 1) & (cc <= W)
    i_even = ((rr - 1) % 2) == 0
    j_even = ((cc - 1) % 2) == 0
    m1 = jnp.stack([interior, i_even, j_even]).astype(jnp.float32).reshape(3, npix)
    masks = jnp.tile(jnp.pad(m1, ((0, 0), (0, P - npix))), (1, bb))

    # weights reshaped for the in-kernel contractions
    w1m = w1.reshape(C, 9)                                  # [co, 3*di+dj]
    w2m = w2.transpose(0, 2, 3, 1).reshape(C, 9 * C)        # [co, (3*di+dj)*C + ci]
    wdm = wd.transpose(2, 3, 1, 0).reshape(4 * C, C)        # rows (2u+v)*C + co
    bdm = jnp.tile(bd, 4).reshape(4 * C, 1)
    w3blk = jnp.kron(jnp.eye(4, dtype=w3.dtype), w3.reshape(1, C))   # (4, 4*C)

    out = pl.pallas_call(
        unet_kernel,
        out_shape=jax.ShapeDtypeStruct((nsteps, 1, L), jnp.float32),
        grid=(nsteps,),
        in_specs=[
            pl.BlockSpec((None, 1, xw), lambda s: (s, 0, 0)),    # x slab (bb images)
            pl.BlockSpec((3, L), lambda s: (0, 0)),              # masks
            pl.BlockSpec((C, 9), lambda s: (0, 0)),              # w1
            pl.BlockSpec((C, 1), lambda s: (0, 0)),              # b1
            pl.BlockSpec((C, 9 * C), lambda s: (0, 0)),          # w2 (im2col layout)
            pl.BlockSpec((C, 1), lambda s: (0, 0)),              # b2
            pl.BlockSpec((4 * C, C), lambda s: (0, 0)),          # convT, 4 taps stacked
            pl.BlockSpec((4 * C, 1), lambda s: (0, 0)),          # bd tiled per tap
            pl.BlockSpec((4, 4 * C), lambda s: (0, 0)),          # block-diag 1x1 conv
            pl.BlockSpec(memory_space=pltpu.MemorySpace.SMEM),   # b3 scalar
        ],
        out_specs=pl.BlockSpec((None, 1, L), lambda s: (s, 0, 0)),
        scratch_shapes=[pltpu.VMEM((C, xw), jnp.float32)],
        compiler_params=pltpu.CompilerParams(
            dimension_semantics=("parallel",)),   # >=2 balanced steps feed both v7x TCs
    )(xf, masks, w1m, b1.reshape(C, 1), w2m, b2.reshape(C, 1),
      wdm, bdm, w3blk, b3.reshape(1, 1))

    y = out.reshape(B_pad, P)[:B, :npix].reshape(B, hp, wp)[:, 1:H + 1, 1:W + 1]
    return y[:, None, :, :]


# ---------------------------------------------------------------------------
# Pure-JAX reference (for correctness check)
# ---------------------------------------------------------------------------
def unet_reference(x, params):
    w1, b1, w2, b2, wd, bd, w3, b3 = params
    dn = ('NCHW', 'OIHW', 'NCHW')
    y = lax.conv_general_dilated(x, w1, (1, 1), ((1, 1), (1, 1)),
                                 dimension_numbers=dn) + b1[None, :, None, None]
    y = jnp.maximum(y, 0.0)
    y = lax.conv_general_dilated(y, w2, (1, 1), ((1, 1), (1, 1)),
                                 dimension_numbers=dn) + b2[None, :, None, None]
    y = jnp.maximum(y, 0.0)
    y = lax.reduce_window(y, -jnp.inf, lax.max, (1, 1, 2, 2), (1, 1, 2, 2), 'VALID')
    B, C, Hp, Wp = y.shape
    up = jnp.einsum('bcij,cokl->boikjl', y, wd).reshape(B, wd.shape[1], 2 * Hp, 2 * Wp)
    up = jnp.maximum(up + bd[None, :, None, None], 0.0)
    z = lax.conv_general_dilated(up, w3, (1, 1), ((0, 0), (0, 0)),
                                 dimension_numbers=dn) + b3[None, :, None, None]
    return jax.nn.sigmoid(z)


# ---------------------------------------------------------------------------
if __name__ == "__main__":
    key = jax.random.PRNGKey(0)
    ks = jax.random.split(key, 9)
    f32 = jnp.float32
    # Deterministic synthetic parameters matching the PyTorch module's shapes.
    w1 = 0.3 * jax.random.normal(ks[0], (8, 1, 3, 3), f32)
    b1 = 0.1 * jax.random.normal(ks[1], (8,), f32)
    w2 = 0.2 * jax.random.normal(ks[2], (8, 8, 3, 3), f32)
    b2 = 0.1 * jax.random.normal(ks[3], (8,), f32)
    wd = 0.2 * jax.random.normal(ks[4], (8, 8, 2, 2), f32)   # ConvTranspose2d: (in, out, kH, kW)
    bd = 0.1 * jax.random.normal(ks[5], (8,), f32)
    w3 = 0.3 * jax.random.normal(ks[6], (1, 8, 1, 1), f32)
    b3 = 0.1 * jax.random.normal(ks[7], (1,), f32)
    params = (w1, b1, w2, b2, wd, bd, w3, b3)

    x = jax.random.normal(ks[8], (2, 1, 16, 16), f32)        # NCHW, like PyTorch

    out = jax.block_until_ready(unet_forward(x, params))
    assert out.shape == (2, 1, 16, 16), out.shape

    ref = jax.block_until_ready(unet_reference(x, params))
    np.testing.assert_allclose(np.asarray(out), np.asarray(ref), rtol=1e-4, atol=1e-4)

    print("KERNEL_OK")
</pallas_src>

<mosaic_0001>
module attributes {stable_mosaic.version = 11 : i64} {
  func.func @unet_kernel(%arg0: i32, %arg1: memref<1x1x806xf32, #tpu.memory_space<vmem>>, %arg2: memref<3x768xf32, #tpu.memory_space<vmem>>, %arg3: memref<8x9xf32, #tpu.memory_space<vmem>>, %arg4: memref<8x1xf32, #tpu.memory_space<vmem>>, %arg5: memref<8x72xf32, #tpu.memory_space<vmem>>, %arg6: memref<8x1xf32, #tpu.memory_space<vmem>>, %arg7: memref<32x8xf32, #tpu.memory_space<vmem>>, %arg8: memref<32x1xf32, #tpu.memory_space<vmem>>, %arg9: memref<4x32xf32, #tpu.memory_space<vmem>>, %arg10: memref<1x1xf32, #tpu.memory_space<smem>>, %arg11: memref<1x1x768xf32, #tpu.memory_space<vmem>>, %arg12: memref<8x806xf32, #tpu.memory_space<vmem>>) attributes {dimension_semantics = [#tpu.dimension_semantics<parallel>], iteration_bounds = array<i64: 1>, scalar_prefetch = 0 : i64, scratch_operands = 1 : i64, tpu.core_type = #tpu.core_type<tc>, window_params = [{transform_indices = @transform_0, window_bounds = array<i64: 1, 1, 806>}, {pipeline_mode = #tpu.pipeline_mode<synchronous>, transform_indices = @transform_1, window_bounds = array<i64: 3, 768>}, {pipeline_mode = #tpu.pipeline_mode<synchronous>, transform_indices = @transform_2, window_bounds = array<i64: 8, 9>}, {pipeline_mode = #tpu.pipeline_mode<synchronous>, transform_indices = @transform_3, window_bounds = array<i64: 8, 1>}, {pipeline_mode = #tpu.pipeline_mode<synchronous>, transform_indices = @transform_4, window_bounds = array<i64: 8, 72>}, {pipeline_mode = #tpu.pipeline_mode<synchronous>, transform_indices = @transform_5, window_bounds = array<i64: 8, 1>}, {pipeline_mode = #tpu.pipeline_mode<synchronous>, transform_indices = @transform_6, window_bounds = array<i64: 32, 8>}, {pipeline_mode = #tpu.pipeline_mode<synchronous>, transform_indices = @transform_7, window_bounds = array<i64: 32, 1>}, {pipeline_mode = #tpu.pipeline_mode<synchronous>, transform_indices = @transform_8, window_bounds = array<i64: 4, 32>}, {transform_indices = @transform_9, window_bounds = array<i64: 1, 1>}, {transform_indices = @transform_10, window_bounds = array<i64: 1, 1, 768>}]} {
    %c0 = arith.constant 0 : index
    %c0_0 = arith.constant 0 : index
    %0 = vector.load %arg2[%c0, %c0_0] : memref<3x768xf32, #tpu.memory_space<vmem>>, vector<1x768xf32>
    %cst = arith.constant 0.000000e+00 : f32
    %1 = vector.broadcast %cst : f32 to vector<1x768xf32>
    %2 = arith.cmpf one, %0, %1 : vector<1x768xf32>
    %c1 = arith.constant 1 : index
    %c0_1 = arith.constant 0 : index
    %3 = vector.load %arg2[%c1, %c0_1] : memref<3x768xf32, #tpu.memory_space<vmem>>, vector<1x768xf32>
    %cst_2 = arith.constant 0.000000e+00 : f32
    %4 = vector.broadcast %cst_2 : f32 to vector<1x768xf32>
    %5 = arith.cmpf one, %3, %4 : vector<1x768xf32>
    %c2 = arith.constant 2 : index
    %c0_3 = arith.constant 0 : index
    %6 = vector.load %arg2[%c2, %c0_3] : memref<3x768xf32, #tpu.memory_space<vmem>>, vector<1x768xf32>
    %cst_4 = arith.constant 0.000000e+00 : f32
    %7 = vector.broadcast %cst_4 : f32 to vector<1x768xf32>
    %8 = arith.cmpf one, %6, %7 : vector<1x768xf32>
    %cst_5 = arith.constant 0.000000e+00 : f32
    %9 = vector.broadcast %cst_5 : f32 to vector<8x19xf32>
    %c0_6 = arith.constant 0 : index
    %c0_7 = arith.constant 0 : index
    %10 = vector.load %arg12[%c0_6, %c0_7] : memref<8x806xf32, #tpu.memory_space<vmem>>, vector<8x19xf32>
    tpu.vector_store %arg12[%c0_6, %c0_7], %9 {strides = array<i32>} : memref<8x806xf32, #tpu.memory_space<vmem>>, vector<8x19xf32>,
    %cst_8 = arith.constant 0.000000e+00 : f32
    %11 = vector.broadcast %cst_8 : f32 to vector<8x19xf32>
    %c0_9 = arith.constant 0 : index
    %c787 = arith.constant 787 : index
    %12 = vector.load %arg12[%c0_9, %c787] : memref<8x806xf32, #tpu.memory_space<vmem>>, vector<8x19xf32>
    tpu.vector_store %arg12[%c0_9, %c787], %11 {strides = array<i32>} : memref<8x806xf32, #tpu.memory_space<vmem>>, vector<8x19xf32>,
    %c0_10 = arith.constant 0 : index
    %c0_11 = arith.constant 0 : index
    %c0_12 = arith.constant 0 : index
    %13 = vector.load %arg1[%c0_10, %c0_11, %c0_12] : memref<1x1x806xf32, #tpu.memory_space<vmem>>, vector<1x1x768xf32>
    %14 = vector.shape_cast %13 : vector<1x1x768xf32> to vector<1x768xf32>
    %c0_13 = arith.constant 0 : index
    %c0_14 = arith.constant 0 : index
    %c1_15 = arith.constant 1 : index
    %15 = vector.load %arg1[%c0_13, %c0_14, %c1_15] : memref<1x1x806xf32, #tpu.memory_space<vmem>>, vector<1x1x768xf32>
    %16 = vector.shape_cast %15 : vector<1x1x768xf32> to vector<1x768xf32>
    %c0_16 = arith.constant 0 : index
    %c0_17 = arith.constant 0 : index
    %c2_18 = arith.constant 2 : index
    %17 = vector.load %arg1[%c0_16, %c0_17, %c2_18] : memref<1x1x806xf32, #tpu.memory_space<vmem>>, vector<1x1x768xf32>
    %18 = vector.shape_cast %17 : vector<1x1x768xf32> to vector<1x768xf32>
    %c0_19 = arith.constant 0 : index
    %c0_20 = arith.constant 0 : index
    %c18 = arith.constant 18 : index
    %19 = vector.load %arg1[%c0_19, %c0_20, %c18] : memref<1x1x806xf32, #tpu.memory_space<vmem>>, vector<1x1x768xf32>
    %20 = vector.shape_cast %19 : vector<1x1x768xf32> to vector<1x768xf32>
    %c0_21 = arith.constant 0 : index
    %c0_22 = arith.constant 0 : index
    %c19 = arith.constant 19 : index
    %21 = vector.load %arg1[%c0_21, %c0_22, %c19] : memref<1x1x806xf32, #tpu.memory_space<vmem>>, vector<1x1x768xf32>
    %22 = vector.shape_cast %21 : vector<1x1x768xf32> to vector<1x768xf32>
    %c0_23 = arith.constant 0 : index
    %c0_24 = arith.constant 0 : index
    %c20 = arith.constant 20 : index
    %23 = vector.load %arg1[%c0_23, %c0_24, %c20] : memref<1x1x806xf32, #tpu.memory_space<vmem>>, vector<1x1x768xf32>
    %24 = vector.shape_cast %23 : vector<1x1x768xf32> to vector<1x768xf32>
    %c0_25 = arith.constant 0 : index
    %c0_26 = arith.constant 0 : index
    %c36 = arith.constant 36 : index
    %25 = vector.load %arg1[%c0_25, %c0_26, %c36] : memref<1x1x806xf32, #tpu.memory_space<vmem>>, vector<1x1x768xf32>
    %26 = vector.shape_cast %25 : vector<1x1x768xf32> to vector<1x768xf32>
    %c0_27 = arith.constant 0 : index
    %c0_28 = arith.constant 0 : index
    %c37 = arith.constant 37 : index
    %27 = vector.load %arg1[%c0_27, %c0_28, %c37] : memref<1x1x806xf32, #tpu.memory_space<vmem>>, vector<1x1x768xf32>
    %28 = vector.shape_cast %27 : vector<1x1x768xf32> to vector<1x768xf32>
    %c0_29 = arith.constant 0 : index
    %c0_30 = arith.constant 0 : index
    %c38 = arith.constant 38 : index
    %29 = vector.load %arg1[%c0_29, %c0_30, %c38] : memref<1x1x806xf32, #tpu.memory_space<vmem>>, vector<1x1x768xf32>
    %30 = vector.shape_cast %29 : vector<1x1x768xf32> to vector<1x768xf32>
    %31 = tpu.concatenate %14, %16, %18, %20, %22, %24, %26, %28, %30 in 0 : vector<1x768xf32>, vector<1x768xf32>, vector<1x768xf32>, vector<1x768xf32>, vector<1x768xf32>, vector<1x768xf32>, vector<1x768xf32>, vector<1x768xf32>, vector<1x768xf32> -> vector<9x768xf32>
    %c0_31 = arith.constant 0 : index
    %c0_32 = arith.constant 0 : index
    %32 = vector.load %arg3[%c0_31, %c0_32] : memref<8x9xf32, #tpu.memory_space<vmem>>, vector<8x9xf32>
    %cst_33 = arith.constant dense<0.000000e+00> : vector<8x768xf32>
    %33 = tpu.matmul %32, %31, %cst_33 {dimension_numbers = #tpu.dot_dimension_numbers<[1], [0], [0], [1], [0, 0, 1, 1], [], []>} : vector<8x9xf32>, vector<9x768xf32>, vector<8x768xf32> -> vector<8x768xf32>
    %c0_34 = arith.constant 0 : index
    %c0_35 = arith.constant 0 : index
    %34 = vector.load %arg4[%c0_34, %c0_35] : memref<8x1xf32, #tpu.memory_space<vmem>>, vector<8x1xf32>
    %35 = vector.broadcast %34 : vector<8x1xf32> to vector<8x768xf32>
    %36 = arith.addf %33, %35 : vector<8x768xf32>
    %cst_36 = arith.constant 0.000000e+00 : f32
    %37 = vector.broadcast %cst_36 : f32 to vector<8x768xf32>
    %38 = arith.maximumf %36, %37 : vector<8x768xf32>
    %cst_37 = arith.constant 0.000000e+00 : f32
    %39 = vector.shape_cast %2 : vector<1x768xi1> to vector<1x768xi1>
    %40 = vector.broadcast %39 : vector<1x768xi1> to vector<8x768xi1>
    %41 = vector.broadcast %cst_37 : f32 to vector<8x768xf32>
    %42 = arith.select %40, %38, %41 : vector<8x768xi1>, vector<8x768xf32>
    %c0_38 = arith.constant 0 : index
    %c19_39 = arith.constant 19 : index
    %43 = vector.load %arg12[%c0_38, %c19_39] : memref<8x806xf32, #tpu.memory_space<vmem>>, vector<8x768xf32>
    tpu.vector_store %arg12[%c0_38, %c19_39], %42 {strides = array<i32>} : memref<8x806xf32, #tpu.memory_space<vmem>>, vector<8x768xf32>,
    %c0_40 = arith.constant 0 : index
    %c0_41 = arith.constant 0 : index
    %44 = vector.load %arg12[%c0_40, %c0_41] : memref<8x806xf32, #tpu.memory_space<vmem>>, vector<8x768xf32>
    %c0_42 = arith.constant 0 : index
    %c1_43 = arith.constant 1 : index
    %45 = vector.load %arg12[%c0_42, %c1_43] : memref<8x806xf32, #tpu.memory_space<vmem>>, vector<8x768xf32>
    %c0_44 = arith.constant 0 : index
    %c2_45 = arith.constant 2 : index
    %46 = vector.load %arg12[%c0_44, %c2_45] : memref<8x806xf32, #tpu.memory_space<vmem>>, vector<8x768xf32>
    %c0_46 = arith.constant 0 : index
    %c18_47 = arith.constant 18 : index
    %47 = vector.load %arg12[%c0_46, %c18_47] : memref<8x806xf32, #tpu.memory_space<vmem>>, vector<8x768xf32>
    %c0_48 = arith.constant 0 : index
    %c19_49 = arith.constant 19 : index
    %48 = vector.load %arg12[%c0_48, %c19_49] : memref<8x806xf32, #tpu.memory_space<vmem>>, vector<8x768xf32>
    %c0_50 = arith.constant 0 : index
    %c20_51 = arith.constant 20 : index
    %49 = vector.load %arg12[%c0_50, %c20_51] : memref<8x806xf32, #tpu.memory_space<vmem>>, vector<8x768xf32>
    %c0_52 = arith.constant 0 : index
    %c36_53 = arith.constant 36 : index
    %50 = vector.load %arg12[%c0_52, %c36_53] : memref<8x806xf32, #tpu.memory_space<vmem>>, vector<8x768xf32>
    %c0_54 = arith.constant 0 : index
    %c37_55 = arith.constant 37 : index
    %51 = vector.load %arg12[%c0_54, %c37_55] : memref<8x806xf32, #tpu.memory_space<vmem>>, vector<8x768xf32>
    %c0_56 = arith.constant 0 : index
    %c38_57 = arith.constant 38 : index
    %52 = vector.load %arg12[%c0_56, %c38_57] : memref<8x806xf32, #tpu.memory_space<vmem>>, vector<8x768xf32>
    %53 = tpu.concatenate %44, %45, %46, %47, %48, %49, %50, %51, %52 in 0 : vector<8x768xf32>, vector<8x768xf32>, vector<8x768xf32>, vector<8x768xf32>, vector<8x768xf32>, vector<8x768xf32>, vector<8x768xf32>, vector<8x768xf32>, vector<8x768xf32> -> vector<72x768xf32>
    %c0_58 = arith.constant 0 : index
    %c0_59 = arith.constant 0 : index
    %54 = vector.load %arg5[%c0_58, %c0_59] : memref<8x72xf32, #tpu.memory_space<vmem>>, vector<8x72xf32>
    %cst_60 = arith.constant dense<0.000000e+00> : vector<8x768xf32>
    %55 = tpu.matmul %54, %53, %cst_60 {dimension_numbers = #tpu.dot_dimension_numbers<[1], [0], [0], [1], [0, 0, 1, 1], [], []>} : vector<8x72xf32>, vector<72x768xf32>, vector<8x768xf32> -> vector<8x768xf32>
    %c0_61 = arith.constant 0 : index
    %c0_62 = arith.constant 0 : index
    %56 = vector.load %arg6[%c0_61, %c0_62] : memref<8x1xf32, #tpu.memory_space<vmem>>, vector<8x1xf32>
    %57 = vector.broadcast %56 : vector<8x1xf32> to vector<8x768xf32>
    %58 = arith.addf %55, %57 : vector<8x768xf32>
    %cst_63 = arith.constant 0.000000e+00 : f32
    %59 = vector.broadcast %cst_63 : f32 to vector<8x768xf32>
    %60 = arith.maximumf %58, %59 : vector<8x768xf32>
    %c0_64 = arith.constant 0 : index
    %c19_65 = arith.constant 19 : index
    %61 = vector.load %arg12[%c0_64, %c19_65] : memref<8x806xf32, #tpu.memory_space<vmem>>, vector<8x768xf32>
    tpu.vector_store %arg12[%c0_64, %c19_65], %60 {strides = array<i32>} : memref<8x806xf32, #tpu.memory_space<vmem>>, vector<8x768xf32>,
    %c0_66 = arith.constant 0 : index
    %c20_67 = arith.constant 20 : index
    %62 = vector.load %arg12[%c0_66, %c20_67] : memref<8x806xf32, #tpu.memory_space<vmem>>, vector<8x768xf32>
    %c0_68 = arith.constant 0 : index
    %c18_69 = arith.constant 18 : index
    %63 = vector.load %arg12[%c0_68, %c18_69] : memref<8x806xf32, #tpu.memory_space<vmem>>, vector<8x768xf32>
    %64 = arith.maximumf %60, %62 : vector<8x768xf32>
    %65 = arith.maximumf %63, %60 : vector<8x768xf32>
    %66 = vector.shape_cast %8 : vector<1x768xi1> to vector<1x768xi1>
    %67 = vector.broadcast %66 : vector<1x768xi1> to vector<8x768xi1>
    %68 = arith.select %67, %64, %65 : vector<8x768xi1>, vector<8x768xf32>
    %c0_70 = arith.constant 0 : index
    %c19_71 = arith.constant 19 : index
    %69 = vector.load %arg12[%c0_70, %c19_71] : memref<8x806xf32, #tpu.memory_space<vmem>>, vector<8x768xf32>
    tpu.vector_store %arg12[%c0_70, %c19_71], %68 {strides = array<i32>} : memref<8x806xf32, #tpu.memory_space<vmem>>, vector<8x768xf32>,
    %c0_72 = arith.constant 0 : index
    %c37_73 = arith.constant 37 : index
    %70 = vector.load %arg12[%c0_72, %c37_73] : memref<8x806xf32, #tpu.memory_space<vmem>>, vector<8x768xf32>
    %c0_74 = arith.constant 0 : index
    %c1_75 = arith.constant 1 : index
    %71 = vector.load %arg12[%c0_74, %c1_75] : memref<8x806xf32, #tpu.memory_space<vmem>>, vector<8x768xf32>
    %72 = arith.maximumf %68, %70 : vector<8x768xf32>
    %73 = arith.maximumf %71, %68 : vector<8x768xf32>
    %74 = vector.shape_cast %5 : vector<1x768xi1> to vector<1x768xi1>
    %75 = vector.broadcast %74 : vector<1x768xi1> to vector<8x768xi1>
    %76 = arith.select %75, %72, %73 : vector<8x768xi1>, vector<8x768xf32>
    %c0_76 = arith.constant 0 : index
    %c0_77 = arith.constant 0 : index
    %77 = vector.load %arg7[%c0_76, %c0_77] : memref<32x8xf32, #tpu.memory_space<vmem>>, vector<32x8xf32>
    %cst_78 = arith.constant dense<0.000000e+00> : vector<32x768xf32>
    %78 = tpu.matmul %77, %76, %cst_78 {dimension_numbers = #tpu.dot_dimension_numbers<[1], [0], [0], [1], [0, 0, 1, 1], [], []>} : vector<32x8xf32>, vector<8x768xf32>, vector<32x768xf32> -> vector<32x768xf32>
    %c0_79 = arith.constant 0 : index
    %c0_80 = arith.constant 0 : index
    %79 = vector.load %arg8[%c0_79, %c0_80] : memref<32x1xf32, #tpu.memory_space<vmem>>, vector<32x1xf32>
    %80 = vector.broadcast %79 : vector<32x1xf32> to vector<32x768xf32>
    %81 = arith.addf %78, %80 : vector<32x768xf32>
    %cst_81 = arith.constant 0.000000e+00 : f32
    %82 = vector.broadcast %cst_81 : f32 to vector<32x768xf32>
    %83 = arith.maximumf %81, %82 : vector<32x768xf32>
    %c0_82 = arith.constant 0 : index
    %c0_83 = arith.constant 0 : index
    %84 = vector.load %arg9[%c0_82, %c0_83] : memref<4x32xf32, #tpu.memory_space<vmem>>, vector<4x32xf32>
    %cst_84 = arith.constant dense<0.000000e+00> : vector<4x768xf32>
    %85 = tpu.matmul %84, %83, %cst_84 {dimension_numbers = #tpu.dot_dimension_numbers<[1], [0], [0], [1], [0, 0, 1, 1], [], []>} : vector<4x32xf32>, vector<32x768xf32>, vector<4x768xf32> -> vector<4x768xf32>
    %86 = vector.extract_strided_slice %85 {offsets = [0, 0], sizes = [1, 768], strides = [1, 1]} : vector<4x768xf32> to vector<1x768xf32>
    %87 = vector.extract_strided_slice %85 {offsets = [1, 0], sizes = [1, 768], strides = [1, 1]} : vector<4x768xf32> to vector<1x768xf32>
    %88 = arith.select %8, %86, %87 : vector<1x768xi1>, vector<1x768xf32>
    %89 = vector.extract_strided_slice %85 {offsets = [2, 0], sizes = [1, 768], strides = [1, 1]} : vector<4x768xf32> to vector<1x768xf32>
    %90 = vector.extract_strided_slice %85 {offsets = [3, 0], sizes = [1, 768], strides = [1, 1]} : vector<4x768xf32> to vector<1x768xf32>
    %91 = arith.select %8, %89, %90 : vector<1x768xi1>, vector<1x768xf32>
    %92 = arith.select %5, %88, %91 : vector<1x768xi1>, vector<1x768xf32>
    %cst_85 = arith.constant 0.000000e+00 : f32
    %93 = vector.broadcast %cst_85 : f32 to vector<1x768xf32>
    %94 = arith.select %2, %92, %93 : vector<1x768xi1>, vector<1x768xf32>
    %c0_86 = arith.constant 0 : index
    %c0_87 = arith.constant 0 : index
    %95 = memref.load %arg10[%c0_86, %c0_87] : memref<1x1xf32, #tpu.memory_space<smem>>
    %96 = vector.broadcast %95 : f32 to vector<1x768xf32>
    %97 = arith.addf %94, %96 : vector<1x768xf32>
    %cst_88 = arith.constant 5.000000e-01 : f32
    %98 = vector.broadcast %cst_88 : f32 to vector<1x768xf32>
    %99 = arith.mulf %98, %97 : vector<1x768xf32>
    %100 = math.tanh %99 : vector<1x768xf32>
    %cst_89 = arith.constant 5.000000e-01 : f32
    %101 = vector.broadcast %cst_89 : f32 to vector<1x768xf32>
    %102 = arith.mulf %101, %100 : vector<1x768xf32>
    %cst_90 = arith.constant 5.000000e-01 : f32
    %103 = vector.broadcast %cst_90 : f32 to vector<1x768xf32>
    %104 = arith.addf %102, %103 : vector<1x768xf32>
    %c0_91 = arith.constant 0 : index
    %c0_92 = arith.constant 0 : index
    %c0_93 = arith.constant 0 : index
    %105 = vector.load %arg11[%c0_91, %c0_92, %c0_93] : memref<1x1x768xf32, #tpu.memory_space<vmem>>, vector<1x1x768xf32>
    %106 = vector.shape_cast %105 : vector<1x1x768xf32> to vector<1x768xf32>
    %107 = vector.shape_cast %104 : vector<1x768xf32> to vector<1x1x768xf32>
    tpu.vector_store %arg11[%c0_91, %c0_92, %c0_93], %107 {strides = array<i32>} : memref<1x1x768xf32, #tpu.memory_space<vmem>>, vector<1x1x768xf32>,
    return
  }
  func.func @transform_0(%arg0: i32) -> (i32, i32, i32) {
    %c0_i32 = arith.constant 0 : i32
    %c0_i32_0 = arith.constant 0 : i32
    %c0_i32_1 = arith.constant 0 : i32
    return %arg0, %c0_i32, %c0_i32_0 : i32, i32, i32
  }
  func.func @transform_1(%arg0: i32) -> (i32, i32) {
    %c0_i32 = arith.constant 0 : i32
    %c0_i32_0 = arith.constant 0 : i32
    %c0_i32_1 = arith.constant 0 : i32
    return %c0_i32, %c0_i32_0 : i32, i32
  }
  func.func @transform_2(%arg0: i32) -> (i32, i32) {
    %c0_i32 = arith.constant 0 : i32
    %c0_i32_0 = arith.constant 0 : i32
    %c0_i32_1 = arith.constant 0 : i32
    return %c0_i32, %c0_i32_0 : i32, i32
  }
  func.func @transform_3(%arg0: i32) -> (i32, i32) {
    %c0_i32 = arith.constant 0 : i32
    %c0_i32_0 = arith.constant 0 : i32
    %c0_i32_1 = arith.constant 0 : i32
    return %c0_i32, %c0_i32_0 : i32, i32
  }
  func.func @transform_4(%arg0: i32) -> (i32, i32) {
    %c0_i32 = arith.constant 0 : i32
    %c0_i32_0 = arith.constant 0 : i32
    %c0_i32_1 = arith.constant 0 : i32
    return %c0_i32, %c0_i32_0 : i32, i32
  }
  func.func @transform_5(%arg0: i32) -> (i32, i32) {
    %c0_i32 = arith.constant 0 : i32
    %c0_i32_0 = arith.constant 0 : i32
    %c0_i32_1 = arith.constant 0 : i32
    return %c0_i32, %c0_i32_0 : i32, i32
  }
  func.func @transform_6(%arg0: i32) -> (i32, i32) {
    %c0_i32 = arith.constant 0 : i32
    %c0_i32_0 = arith.constant 0 : i32
    %c0_i32_1 = arith.constant 0 : i32
    return %c0_i32, %c0_i32_0 : i32, i32
  }
  func.func @transform_7(%arg0: i32) -> (i32, i32) {
    %c0_i32 = arith.constant 0 : i32
    %c0_i32_0 = arith.constant 0 : i32
    %c0_i32_1 = arith.constant 0 : i32
    return %c0_i32, %c0_i32_0 : i32, i32
  }
  func.func @transform_8(%arg0: i32) -> (i32, i32) {
    %c0_i32 = arith.constant 0 : i32
    %c0_i32_0 = arith.constant 0 : i32
    %c0_i32_1 = arith.constant 0 : i32
    return %c0_i32, %c0_i32_0 : i32, i32
  }
  func.func @transform_9(%arg0: i32) -> (i32, i32) {
    %c0_i32 = arith.constant 0 : i32
    %c0_i32_0 = arith.constant 0 : i32
    %c0_i32_1 = arith.constant 0 : i32
    return %c0_i32, %c0_i32_0 : i32, i32
  }
  func.func @transform_10(%arg0: i32) -> (i32, i32, i32) {
    %c0_i32 = arith.constant 0 : i32
    %c0_i32_0 = arith.constant 0 : i32
    %c0_i32_1 = arith.constant 0 : i32
    return %arg0, %c0_i32, %c0_i32_0 : i32, i32, i32
  }
}

</mosaic_0001>

<bundles_post_ra>
// kernel: tile.18
= control target key start
LH: loop header
LB: loop body
LE: loop exit
PB: predicated region body
PF: predicated region fallthrough
CT: control target
= control target key end

     0   :  { %s22_s0 = inlined_call_operand.vmem [shape: f32[8], index: 0, kind: input, shape index: {}]   ;;  %s23_s1 = inlined_call_operand.vmem [shape: f32[4,8], index: 1, kind: output, shape index: {}]  }
   0x1   :  { %v4_v0 = vld [vmem:[%s22_s0] ss:$0 sm:$0xff] }
   0x2   :  { %5 = vst [vmem:[%s23_s1] sm:$0xf] %v4_v0 }

// kernel: tile.0
= control target key start
LH: loop header
LB: loop body
LE: loop exit
PB: predicated region body
PF: predicated region fallthrough
CT: control target
= control target key end

     0   :  { %s66_s8 = smov 125   ;;  %vm7_vm0 = vcmask 7168   ;;  %s67_s11 = smov 126   ;;  %s117_s0 = inlined_call_operand.vmem [shape: f32[4,8], index: 0, kind: input, shape index: {}]   ;;  %s118_s1 = inlined_call_operand.vmem [shape: f32[32,1], index: 1, kind: output, shape index: {}]  }
   0x1   :  { %v4_v0 = vld [vmem:[%s117_s0] sm:$0xf]  ;;  %s65_s0 = smov 127   ;;  %s68_s12 = smov 124  }
   0x2   :  { %5 = vst [vmem:[#allocation0] sm:$0xf] %v4_v0  ;;  %s69_s13 = smov 123   ;;  %s70_s14 = smov 122  }
   0x3   :  { %s71_s15 = smov 121  }
   0x9   :  { %v9_v1 = vld [vmem:[#allocation0] sm:$0xf]  }
   0xa   :  { %v21_v2 = vld [vmem:[#allocation0] sm:$0xf]   ;;  %10 = vrot.lane.b32.xlu0 %v9_v1, %s65_s0 }
   0xb   :  { %22 = vrot.lane.b32.xlu1 %v21_v2, %s66_s8  ;;  %v15_v3 = vld [vmem:[#allocation0] sm:$0xf]  }
   0xc   :  { %v27_v4 = vld [vmem:[#allocation0] sm:$0xf]  }
   0xd   :  { %v6_v5 = vld [vmem:[#allocation0] sm:$0xf]  }
   0xe   :  { %8 = vst.msk [vmem:[%s118_s1] ss:$8 sm:$0xf] %vm7_vm0, %v6_v5   ;;  %16 = vrot.lane.b32.xlu0 %v15_v3, %s67_s11  ;;  %v33_v6 = vld [vmem:[#allocation0] sm:$0xf]  }
   0xf   :  { %28 = vrot.lane.b32.xlu1 %v27_v4, %s68_s12  ;;  %v39_v7 = vld [vmem:[#allocation0] sm:$0xf]  }
  0x10   :  { %v45_v8 = vld [vmem:[#allocation0] sm:$0xf]  }
  0x12   :  { %34 = vrot.lane.b32.xlu0 %v33_v6, %s69_s13 }
  0x13   :  { %40 = vrot.lane.b32.xlu1 %v39_v7, %s70_s14 }
  0x16   :  { %46 = vrot.lane.b32.xlu0 %v45_v8, %s71_s15 }
  0x7c   :  { %v11_v9 = vpop.permute.xlu0 %10  }
  0x7d   :  { %v23_v10 = vpop.permute.xlu1 %22   ;;  %51 = vst.msk [vmem:[%s118_s1 + $0x1] ss:$8 sm:$0xf] %vm7_vm0, %v11_v9  }
  0x7e   :  { %53 = vst.msk [vmem:[%s118_s1 + $0x3] ss:$8 sm:$0xf] %vm7_vm0, %v23_v10  }
  0x80   :  { %v17_v11 = vpop.permute.xlu0 %16  }
  0x81   :  { %v29_v12 = vpop.permute.xlu1 %28   ;;  %52 = vst.msk [vmem:[%s118_s1 + $0x2] ss:$8 sm:$0xf] %vm7_vm0, %v17_v11  }
  0x82   :  { %54 = vst.msk [vmem:[%s118_s1 + $0x4] ss:$8 sm:$0xf] %vm7_vm0, %v29_v12  }
  0x84   :  { %v35_v13 = vpop.permute.xlu0 %34  }
  0x85   :  { %v41_v14 = vpop.permute.xlu1 %40   ;;  %55 = vst.msk [vmem:[%s118_s1 + $0x5] ss:$8 sm:$0xf] %vm7_vm0, %v35_v13  }
  0x86   :  { %56 = vst.msk [vmem:[%s118_s1 + $0x6] ss:$8 sm:$0xf] %vm7_vm0, %v41_v14  }
  0x88   :  { %v47_v15 = vpop.permute.xlu0 %46  }
  0x89   :  { %57 = vst.msk [vmem:[%s118_s1 + $0x7] ss:$8 sm:$0xf] %vm7_vm0, %v47_v15  }

// kernel: unet_forward.1
= control target key start
LH: loop header
LB: loop body
LE: loop exit
PB: predicated region body
PF: predicated region fallthrough
CT: control target
= control target key end

     0   :  { %v3484_v0 = vlaneseq  ;;  %s2510_s15 = smov 126   ;;  %s2511_s16 = smov 127   ;;  %v2518_v20 = vmov 0.0   ;;  %v3485_v22 = vmov 0   ;;  %vm3490_vm0 = vcmask 1039360   ;;  %s3473_s0 = inlined_call_operand.vmem [shape: f32[1,1,806], index: 0, kind: input, shape index: {}]   ;;  %s3474_s3 = inlined_call_operand.vmem [shape: f32[8,1], index: 3, kind: input, shape index: {}]   ;;  %s3475_s2 = inlined_call_operand.vmem [shape: f32[8,9], index: 2, kind: input, shape index: {}]   ;;  %s3476_s1 = inlined_call_operand.vmem [shape: f32[3,768], index: 1, kind: input, shape index: {}]   ;;  %s3477_s5 = inlined_call_operand.vmem [shape: f32[8,1], index: 5, kind: input, shape index: {}]   ;;  %s3478_s4 = inlined_call_operand.vmem [shape: f32[8,72], index: 4, kind: input, shape index: {}]   ;;  %s3479_s7 = inlined_call_operand.vmem [shape: f32[32,1], index: 7, kind: input, shape index: {}]   ;;  %s3480_s6 = inlined_call_operand.vmem [shape: f32[32,8], index: 6, kind: input, shape index: {}]   ;;  %s3481_s8 = inlined_call_operand.vmem [shape: f32[4,32], index: 8, kind: input, shape index: {}]   ;;  %s3482_s9 = inlined_call_operand.<no memory space> [shape: f32[1,1], index: 9, kind: input, shape index: {}]   ;;  %s3483_s10 = inlined_call_operand.vmem [shape: f32[1,1,768], index: 10, kind: output, shape index: {}]  }
   0x1   :  { %v49_v2 = vld [vmem:[%s3473_s0] sm:$0x7f]  ;;  %s2512_s17 = smov 110   ;;  %s2513_s18 = smov 109   ;;  %456 = vmatprep.mubr.f32.mxu0 %v2518_v20  ;;  %983 = vmatprep.mubr.f32.mxu1 %v2518_v20  ;;  %vm3488_vm1 = vcmask 1031168   ;;  %vm320_vm2 = vcmask 1040384  }
   0x2   :  { %v2581_v1 = vshrl.u32 %v3484_v0, 7  ;;  %s2514_s19 = smov 108   ;;  %s2515_s20 = smov 92   ;;  %2401 = vset.pattern.permute.xlu0 %v3485_v22  ;;  %2507 = vset.pattern.permute.xlu1 %v3485_v22  ;;  %v370_v23 = vld [vmem:[%s3474_s3] sm:$0xff]  ;;  %vm327_vm3 = vcmask 1041408   ;;  %vm178_vm4 = vcmask 900096  }
   0x3   :  { %s2516_s21 = smov 91   ;;  %s2517_s22 = smov 90   ;;  %v2671_v36 = vld [vmem:[%s3473_s0] sm:$0x3f]  ;;  %vm334_vm5 = vcmask 1042432   ;;  %vm3487_vm6 = vcmask 891904  }
   0x4   :  { %v2587_v3 = vsub.s32 1, %v2581_v1  ;;  %v2590_v4 = vsub.s32 2, %v2581_v1  ;;  %v2593_v5 = vsub.s32 0, %v2581_v1  ;;  %v2596_v6 = vsub.s32 3, %v2581_v1  ;;  %s2521_s28 = smov 19   ;;  %s2523_s14 = smov 1  }
   0x5   :  { %v2603_v12 = vsub.s32 4, %v2581_v1  ;;  %v2608_v14 = vsub.s32 5, %v2581_v1  ;;  %v108_v18 = vsub.s32 6, %v2581_v1  ;;  %vm232_vm7 = vcmask 883712  }
   0x6   :  { %v89_v7 = vrot.slane %v49_v2, %v2587_v3  ;;  %v93_v8 = vrot.slane %v49_v2, %v2590_v4  ;;  %v85_v9 = vrot.slane %v49_v2, %v2593_v5  ;;  %v97_v10 = vrot.slane %v49_v2, %v2596_v6 }
   0x7   :  { %v101_v15 = vrot.slane %v49_v2, %v2603_v12  ;;  %v105_v16 = vrot.slane %v49_v2, %v2608_v14  ;;  %v109_v19 = vrot.slane %v49_v2, %v108_v18  ;;  %v58_v41 = vrot.slane %v2671_v36, %v2587_v3 }
   0x8   :  { %v2291_v11 = vpack.i.bf16 %v93_v8, %v89_v7  ;;  %v2296_v13 = vpack.i.bf16 %v97_v10, %v85_v9  ;;  %v54_v43 = vrot.slane %v2671_v36, %v2593_v5  ;;  %v62_v44 = vrot.slane %v2671_v36, %v2590_v4 }
   0x9   :  { %v2316_v17 = vpack.i.bf16 %v105_v16, %v101_v15  ;;  %v2396_v21 = vpack.i.bf16 %v109_v19, %v105_v16  ;;  %v66_v47 = vrot.slane %v2671_v36, %v2596_v6  ;;  %vm341_vm8 = vcmask 1043456  }
   0xa   :  { %2292 = vrot.lane.b32.xlu1 %v2291_v11, %s2510_s15  ;;  %2282 = vrot.lane.b32.xlu0 %v2291_v11, %s2511_s16  ;;  %vm348_vm9 = vcmask 1044480   ;;  %vm259_vm10 = vcmask 752640   ;;  %vm286_vm11 = vcmask 744448   ;;  %vm355_vm12 = vcmask 1045504  }
   0xb   :  { %v74_v57 = vrot.slane %v2671_v36, %v2608_v14  ;;  %vm313_vm13 = vcmask 736256   ;;  %vm3489_vm14 = vcmask 1046528   ;;  %vm376_vm15 = vcmask 72704  }
   0xe   :  { %2297 = vrot.lane.b32.xlu1 %v2296_v13, %s2510_s15  ;;  %2287 = vrot.lane.b32.xlu0 %v2296_v13, %s2511_s16 }
  0x12   :  { %2307 = vrot.lane.b32.xlu1 %v2296_v13, %s2512_s17  ;;  %2302 = vrot.lane.b32.xlu0 %v2291_v11, %s2512_s17 }
  0x16   :  { %2317 = vrot.lane.b32.xlu1 %v2316_v17, %s2511_s16  ;;  %2312 = vrot.lane.b32.xlu0 %v2291_v11, %s2513_s18 }
  0x1a   :  { %2327 = vrot.lane.b32.xlu1 %v2291_v11, %s2514_s19  ;;  %2322 = vrot.lane.b32.xlu0 %v2296_v13, %s2513_s18 }
  0x1e   :  { %2337 = vrot.lane.b32.xlu1 %v2296_v13, %s2514_s19  ;;  %2332 = vrot.lane.b32.xlu0 %v2316_v17, %s2510_s15 }
  0x22   :  { %2347 = vrot.lane.b32.xlu1 %v2316_v17, %s2512_s17  ;;  %2342 = vrot.lane.b32.xlu0 %v2291_v11, %s2515_s20 }
  0x26   :  { %2357 = vrot.lane.b32.xlu1 %v2291_v11, %s2516_s21  ;;  %2352 = vrot.lane.b32.xlu0 %v2296_v13, %s2515_s20 }
  0x2a   :  { %2367 = vrot.lane.b32.xlu1 %v2296_v13, %s2516_s21  ;;  %2362 = vrot.lane.b32.xlu0 %v2316_v17, %s2513_s18 }
  0x2e   :  { %122 = vrot.lane.b32.xlu1 %v109_v19, %s2511_s16  ;;  %2372 = vrot.lane.b32.xlu0 %v2291_v11, %s2517_s22 }
  0x32   :  { %2382 = vrot.lane.b32.xlu1 %v2296_v13, %s2517_s22  ;;  %2377 = vrot.lane.b32.xlu0 %v2316_v17, %s2514_s19 }
  0x36   :  { %2387 = vrot.lane.b32.xlu1 %v2316_v17, %s2515_s20  ;;  %149 = vrot.lane.b32.xlu0 %v109_v19, %s2510_s15 }
  0x3a   :  { %2392 = vrot.lane.b32.xlu1 %v2316_v17, %s2516_s21  ;;  %176 = vrot.lane.b32.xlu0 %v109_v19, %s2512_s17 }
  0x3e   :  { %307 = vrot.lane.b32.xlu1 %v101_v15, %s2517_s22  ;;  %203 = vrot.lane.b32.xlu0 %v109_v19, %s2513_s18 }
  0x42   :  { %257 = vrot.lane.b32.xlu1 %v109_v19, %s2515_s20  ;;  %230 = vrot.lane.b32.xlu0 %v109_v19, %s2514_s19 }
  0x46   :  { %2397 = vrot.lane.b32.xlu1 %v2396_v21, %s2517_s22  ;;  %284 = vrot.lane.b32.xlu0 %v109_v19, %s2516_s21 }
  0x4a   :  { %373 = vperm.xlu0 %2401, %v370_v23  }
  0x7c   :  { %v2650_v24 = vpop.permute.xlu1 %2292  ;;  %v2283_v25 = vpop.permute.xlu0 %2282 }
  0x7d   :  { %v2285_v34 = vunpack.i.h.bf16 %v2283_v25  ;;  %v2284_v35 = vunpack.i.l.bf16 %v2283_v25  ;;  %v2295_v39 = vunpack.i.h.bf16 %v2650_v24  ;;  %v2294_v40 = vunpack.i.l.bf16 %v2650_v24 }
  0x7f   :  { %v126_v42 = vsel %vm3490_vm0, %v2284_v35, %v2285_v34  ;;  %v153_v49 = vsel %vm3488_vm1, %v2294_v40, %v2295_v39 }
  0x80   :  { %v2652_v26 = vpop.permute.xlu1 %2297  ;;  %v2654_v27 = vpop.permute.xlu0 %2287  ;;  %v322_v50 = vsel %vm320_vm2, %v58_v41, %v126_v42 }
  0x81   :  { %v2290_v51 = vunpack.i.h.bf16 %v2654_v27  ;;  %v2289_v52 = vunpack.i.l.bf16 %v2654_v27  ;;  %v2300_v58 = vunpack.i.h.bf16 %v2652_v26  ;;  %v2299_v59 = vunpack.i.l.bf16 %v2652_v26 }
  0x82   :  { %v329_v62 = vsel %vm327_vm3, %v322_v50, %v153_v49 }
  0x83   :  { %v127_v7 = vsel %vm3490_vm0, %v2285_v34, %v2290_v51  ;;  %v125_v8 = vsel %vm3490_vm0, %v2289_v52, %v2284_v35  ;;  %v154_v19 = vsel %vm3488_vm1, %v2295_v39, %v2300_v58  ;;  %v152_v21 = vsel %vm3488_vm1, %v2299_v59, %v2294_v40 }
  0x84   :  { %v2656_v28 = vpop.permute.xlu1 %2307  ;;  %v2658_v29 = vpop.permute.xlu0 %2302  ;;  %v321_v25 = vsel %vm320_vm2, %v54_v43, %v125_v8  ;;  %v323_v34 = vsel %vm320_vm2, %v62_v44, %v127_v7 }
  0x85   :  { %v2305_v53 = vunpack.i.h.bf16 %v2658_v29  ;;  %v2304_v54 = vunpack.i.l.bf16 %v2658_v29  ;;  %v2309_v11 = vunpack.i.l.bf16 %v2656_v28  ;;  %v2310_v39 = vunpack.i.h.bf16 %v2656_v28 }
  0x86   :  { %v330_v27 = vsel %vm327_vm3, %v323_v34, %v154_v19  ;;  %v2832_v34 = vld [vmem:[%s3475_s2] sm:$0xff] }
  0x87   :  { %v180_v13 = vsel %vm178_vm4, %v2304_v54, %v2305_v53  ;;  %v179_v43 = vsel %vm178_vm4, %v2309_v11, %v2304_v54  ;;  %v328_v11 = vsel %vm327_vm3, %v321_v25, %v152_v21 }
  0x88   :  { %v2660_v30 = vpop.permute.xlu1 %2317  ;;  %v2662_v31 = vpop.permute.xlu0 %2312  ;;  %v336_v40 = vsel %vm334_vm5, %v329_v62, %v180_v13  ;;  %v335_v48 = vsel %vm334_vm5, %v328_v11, %v179_v43 }
  0x89   :  { %v2315_v60 = vunpack.i.h.bf16 %v2662_v31  ;;  %v2314_v61 = vunpack.i.l.bf16 %v2662_v31  ;;  %v2319_v13 = vunpack.i.l.bf16 %v2660_v30 }
  0x8b   :  { %v207_v23 = vsel %vm3487_vm6, %v2314_v61, %v2315_v60 }
  0x8c   :  { %v2664_v32 = vpop.permute.xlu1 %2327  ;;  %v2666_v33 = vpop.permute.xlu0 %2322  ;;  %v343_v59 = vsel %vm341_vm8, %v336_v40, %v207_v23 }
  0x8d   :  { %v2330_v63 = vunpack.i.h.bf16 %v2664_v32  ;;  %v2329_v2 = vunpack.i.l.bf16 %v2664_v32  ;;  %v2324_v24 = vunpack.i.l.bf16 %v2666_v33 }
  0x8f   :  { %v234_v35 = vsel %vm232_vm7, %v2329_v2, %v2330_v63  ;;  %v206_v62 = vsel %vm3487_vm6, %v2324_v24, %v2314_v61  ;;  %vm2520_vm6 = vmmov 1  }
  0x90   :  { %v2673_v37 = vpop.permute.xlu1 %2337  ;;  %v2675_v38 = vpop.permute.xlu0 %2332  ;;  %v350_v54 = vsel %vm348_vm9, %v343_v59, %v234_v35  ;;  %vm2774_vm1 = vmpackc.low %vm320_vm2, %vm2520_vm6  ;;  %vm3493_vm6 = vcmask 1031168  }
  0x91   :  { %v2339_v41 = vunpack.i.l.bf16 %v2673_v37  ;;  %v2334_v25 = vunpack.i.l.bf16 %v2675_v38 }
  0x93   :  { %v233_v0 = vsel %vm232_vm7, %v2339_v41, %v2329_v2  ;;  %v342_v2 = vsel %vm341_vm8, %v335_v48, %v206_v62  ;;  %v128_v48 = vsel %vm3490_vm0, %v2290_v51, %v2319_v13  ;;  %v2320_v51 = vunpack.i.h.bf16 %v2660_v30 }
  0x94   :  { %v2686_v45 = vpop.permute.xlu1 %2347  ;;  %v2688_v46 = vpop.permute.xlu0 %2342  ;;  %v349_v43 = vsel %vm348_vm9, %v342_v2, %v233_v0  ;;  %v324_v26 = vsel %vm320_vm2, %v66_v47, %v128_v48 }
  0x95   :  { %v2345_v9 = vunpack.i.h.bf16 %v2688_v46  ;;  %v2344_v10 = vunpack.i.l.bf16 %v2688_v46 }
  0x97   :  { %v261_v49 = vsel %vm259_vm10, %v2344_v10, %v2345_v9 }
  0x98   :  { %v2700_v55 = vpop.permute.xlu1 %2357  ;;  %v2702_v56 = vpop.permute.xlu0 %2352  ;;  %v357_v22 = vsel %vm355_vm12, %v350_v54, %v261_v49 }
  0x99   :  { %v2360_v15 = vunpack.i.h.bf16 %v2700_v55  ;;  %v2359_v16 = vunpack.i.l.bf16 %v2700_v55  ;;  %v2354_v42 = vunpack.i.l.bf16 %v2702_v56 }
  0x9b   :  { %v288_v28 = vsel %vm286_vm11, %v2359_v16, %v2360_v15  ;;  %v260_v23 = vsel %vm259_vm10, %v2354_v42, %v2344_v10  ;;  %v2349_v42 = vunpack.i.l.bf16 %v2686_v45 }
  0x9c   :  { %v2725_v17 = vpop.permute.xlu1 %2367  ;;  %v2727_v18 = vpop.permute.xlu0 %2362  ;;  %v364_v24 = vsel %vm3489_vm14, %v357_v22, %v288_v28  ;;  %v181_v22 = vsel %vm178_vm4, %v2305_v53, %v2310_v39  ;;  %v2325_v28 = vunpack.i.h.bf16 %v2666_v33  ;;  %v356_v29 = vsel %vm355_vm12, %v349_v43, %v260_v23 }
  0x9d   :  { %v2369_v44 = vunpack.i.l.bf16 %v2725_v17  ;;  %v2364_v59 = vunpack.i.l.bf16 %v2727_v18  ;;  %v2340_v53 = vunpack.i.h.bf16 %v2673_v37  ;;  %v155_v33 = vsel %vm3493_vm6, %v2300_v58, %v2334_v25 }
  0x9e   :  { %v337_v37 = vsel %vm334_vm5, %v330_v27, %v181_v22  ;;  %v2335_v23 = vunpack.i.h.bf16 %v2675_v38  ;;  %vm3494_vm6 = vcmask 891904   ;;  %v2355_v58 = vunpack.i.h.bf16 %v2702_v56 }
  0x9f   :  { %v287_v40 = vsel %vm286_vm11, %v2369_v44, %v2359_v16  ;;  %v208_v30 = vsel %vm3494_vm6, %v2315_v60, %v2325_v28  ;;  %v235_v31 = vsel %vm232_vm7, %v2330_v63, %v2340_v53  ;;  %v331_v47 = vsel %vm327_vm3, %v324_v26, %v155_v33 }
  0xa0   :  { %v2751_v50 = vpop.permute.xlu1 %122  ;;  %v2753_v52 = vpop.permute.xlu0 %2372  ;;  %v363_v0 = vsel %vm3489_vm14, %v356_v29, %v287_v40  ;;  %vm3495_vm14 = vmmov %vm3494_vm6  ;;  %v2370_v56 = vunpack.i.h.bf16 %v2725_v17  ;;  %v3501_v26 = vrot.slane %v2671_v36, %v2603_v12 }
  0xa1   :  { %v2375_v7 = vunpack.i.h.bf16 %v2753_v52  ;;  %v2374_v8 = vunpack.i.l.bf16 %v2753_v52  ;;  %v209_v38 = vsel %vm3495_vm14, %v2325_v28, %v2364_v59  ;;  %vm3496_vm14 = vcmask 1031168  }
  0xa2   :  { %v156_v17 = vsel %vm3496_vm14, %v2334_v25, %v2335_v23  ;;  %v289_v25 = vsel %vm286_vm11, %v2360_v15, %v2370_v56  ;;  %v130_v48 = vsel %vm3490_vm0, %v2320_v51, %v2751_v50  ;;  %vm3497_vm6 = vmmov %vm3496_vm14  ;;  %vm3498_vm14 = vcmask 1046528  }
  0xa3   :  { %v315_v61 = vsel %vm313_vm13, %v2374_v8, %v2375_v7  ;;  %v326_v52 = vsel %vm320_vm2, %v74_v57, %v130_v48 }
  0xa4   :  { %v2780_v35 = vpop.permute.xlu1 %2382  ;;  %v2782_v41 = vpop.permute.xlu0 %2377  ;;  %v2176_v10 = vpack.c.bf16 %v315_v61, %v364_v24 }
  0xa5   :  { %v2384_v49 = vunpack.i.l.bf16 %v2780_v35  ;;  %v2379_v16 = vunpack.i.l.bf16 %v2782_v41  ;;  %v2385_v24 = vunpack.i.h.bf16 %v2780_v35  ;;  %v2350_v35 = vunpack.i.h.bf16 %v2686_v45 }
  0xa6   :  { %2178 = vmatprep.subr.msk.bf16.mxu0 %vm2774_vm1, %v2176_v10  ;;  %v344_v10 = vsel %vm341_vm8, %v337_v37, %v208_v30  ;;  %v2380_v50 = vunpack.i.h.bf16 %v2782_v41 }
  0xa7   :  { %v314_v44 = vsel %vm313_vm13, %v2384_v49, %v2374_v8  ;;  %v182_v8 = vsel %vm178_vm4, %v2310_v39, %v2349_v42  ;;  %v236_v60 = vsel %vm232_vm7, %v2340_v53, %v2379_v16  ;;  %v129_v39 = vsel %vm3490_vm0, %v2319_v13, %v2320_v51  ;;  %vm3499_vm0 = vmmov %vm3498_vm14 }
  0xa8   :  { %v2808_v62 = vpop.permute.xlu1 %2387  ;;  %v150_v54 = vpop.permute.xlu0 %149  ;;  %v2179_v11 = vpack.c.bf16 %v314_v44, %v363_v0  ;;  %v338_v61 = vsel %vm334_vm5, %v331_v47, %v182_v8  ;;  %v351_v13 = vsel %vm348_vm9, %v344_v10, %v235_v31  ;;  %v262_v49 = vsel %vm259_vm10, %v2345_v9, %v2355_v58 }
  0xa9   :  { %v2389_v19 = vunpack.i.l.bf16 %v2808_v62  ;;  %v345_v40 = vsel %vm341_vm8, %v338_v61, %v209_v38  ;;  %v2365_v53 = vunpack.i.h.bf16 %v2727_v18  ;;  %v316_v46 = vsel %vm313_vm13, %v2375_v7, %v2385_v24 }
  0xaa   :  { %2181 = vmatpush1.bf16.msk.msra.mxu0 %vm2774_vm1, %v2179_v11  ;;  %v352_v43 = vsel %vm348_vm9, %v345_v40, %v236_v60  ;;  %v157_v9 = vsel %vm3497_vm6, %v2335_v23, %v150_v54  ;;  %v358_v15 = vsel %vm355_vm12, %v351_v13, %v262_v49  ;;  %vm3500_vm6 = vcmask 891904  }
  0xab   :  { %v263_v32 = vsel %vm259_vm10, %v2355_v58, %v2389_v19  ;;  %v365_v7 = vsel %vm3499_vm0, %v358_v15, %v289_v25  ;;  %v183_v11 = vsel %vm178_vm4, %v2349_v42, %v2350_v35  ;;  %v2390_v23 = vunpack.i.h.bf16 %v2808_v62  ;;  %vm3502_vm0 = vmmov %vm3500_vm6 }
  0xac   :  { %v2393_v2 = vpop.permute.xlu1 %2392  ;;  %v177_v63 = vpop.permute.xlu0 %176  ;;  %v359_v29 = vsel %vm355_vm12, %v352_v43, %v263_v32  ;;  %v2185_v37 = vpack.c.bf16 %v316_v46, %v365_v7  ;;  %v333_v8 = vsel %vm327_vm3, %v326_v52, %v157_v9  ;;  %v325_v30 = vsel %vm320_vm2, %v3501_v26, %v129_v39  ;;  %vm3503_vm2 = vmmov %vm3498_vm14  ;;  %v2937_v43 = vld [vmem:[%s3476_s1] ss:$4 sm:$0x3f] }
  0xad   :  { %v2394_v22 = vunpack.i.l.bf16 %v2393_v2  ;;  %2151 = vmatmul.mubr.msk.f32.vlgmr.msra.gmra.mrb[0].mxu0 %vm376_vm15, %v2832_v34  ;;  %v184_v27 = vsel %vm178_vm4, %v2350_v35, %v177_v63  ;;  %v210_v57 = vsel %vm3502_vm0, %v2364_v59, %v2365_v53  ;;  %v2395_v58 = vunpack.i.h.bf16 %v2393_v2 }
  0xae   :  { %527 = vmatprep.mubr.f32.mxu0 %v2518_v20  ;;  %v340_v38 = vsel %vm334_vm5, %v333_v8, %v184_v27  ;;  %v332_v42 = vsel %vm327_vm3, %v325_v30, %v156_v17  ;;  %v237_v36 = vsel %vm232_vm7, %v2379_v16, %v2380_v50  ;;  %v264_v41 = vsel %vm259_vm10, %v2389_v19, %v2390_v23  ;;  %vm3504_vm3 = vmmov %vm3503_vm2 }
  0xaf   :  { %v290_v28 = vsel %vm286_vm11, %v2370_v56, %v2394_v22  ;;  %v339_v59 = vsel %vm334_vm5, %v332_v42, %v183_v11  ;;  %v291_v61 = vsel %vm286_vm11, %v2394_v22, %v2395_v58  ;;  %vm44_vm5 = vcmask 154624  }
  0xb0   :  { %v308_v44 = vpop.permute.xlu1 %307  ;;  %v366_v55 = vsel %vm3498_vm14, %v359_v29, %v290_v28  ;;  %v204_v0 = vpop.permute.xlu0 %203  ;;  %v346_v39 = vsel %vm341_vm8, %v339_v59, %v210_v57  ;;  %45 = vst.msk [vmem:[#allocation2] sm:$0xff] %vm44_vm5, %v2518_v20  ;;  %v3505_v25 = vmov 0   ;;  %vm46_vm14 = vcmask 310424  }
  0xb1   :  { %v317_v51 = vsel %vm313_vm13, %v2385_v24, %v308_v44  ;;  %v211_v54 = vsel %vm3500_vm6, %v2365_v53, %v204_v0  ;;  %v353_v16 = vsel %vm348_vm9, %v346_v39, %v237_v36  ;;  %47 = vst.msk [vmem:[#allocation2 + $0x30] sm:$0xff] %vm46_vm14, %v2518_v20 }
  0xb2   :  { %v2182_v33 = vpack.c.bf16 %v317_v51, %v366_v55  ;;  %v347_v47 = vsel %vm341_vm8, %v340_v38, %v211_v54  ;;  %v360_v62 = vsel %vm355_vm12, %v353_v16, %v264_v41  ;;  %vm37_vm8 = vcmp.ne.f32.partialorder %v2937_v43, 0.0 }
  0xb3   :  { %v367_v22 = vsel %vm3504_vm3, %v360_v62, %v291_v61  ;;  %v611_v21 = vsel %vm37_vm8, 1, %v3505_v25  ;;  %vm3506_vm3 = vcmask 1039360  }
  0xb4   :  { %v258_v45 = vpop.permute.xlu1 %257  ;;  %v231_v31 = vpop.permute.xlu0 %230  ;;  %2184 = vmatprep.subr.msk.bf16.mxu0 %vm2774_vm1, %v2182_v33  ;;  %v619_v28 = vrot.slane %v611_v21, %v2587_v3  ;;  %v627_v27 = vrot.slane %v611_v21, %v2596_v6  ;;  %v631_v8 = vrot.slane %v611_v21, %v2603_v12  ;;  %v635_v26 = vrot.slane %v611_v21, %v2608_v14 }
  0xb5   :  { %v238_v18 = vsel %vm232_vm7, %v2380_v50, %v231_v31  ;;  %2187 = vmatpush1.bf16.msk.msra.mxu0 %vm2774_vm1, %v2185_v37  ;;  %v265_v56 = vsel %vm259_vm10, %v2390_v23, %v258_v45  ;;  %v623_v50 = vrot.slane %v611_v21, %v2590_v4 }
  0xb6   :  { %v354_v60 = vsel %vm348_vm9, %v347_v47, %v238_v18  ;;  %vm637_vm9 = vcmp.eq.s32.totalorder %v619_v28, 1  ;;  %vm640_vm6 = vcmp.eq.s32.totalorder %v631_v8, 1  ;;  %vm641_vm0 = vcmp.eq.s32.totalorder %v635_v26, 1 }
  0xb7   :  { %v361_v17 = vsel %vm355_vm12, %v354_v60, %v265_v56  ;;  %vm638_vm12 = vcmp.eq.s32.totalorder %v623_v50, 1 }
  0xb8   :  { %v2398_v24 = vpop.permute.xlu1 %2397  ;;  %v285_v32 = vpop.permute.xlu0 %284  ;;  %2154 = vmatmul.mubr.msk.f32.vlgmr.msra.gmra.mrb[2].mxu0 %vm376_vm15, %v2832_v34 }
  0xb9   :  { %v2400_v2 = vunpack.i.h.bf16 %v2398_v24  ;;  %v2399_v63 = vunpack.i.l.bf16 %v2398_v24  ;;  %v292_v10 = vsel %vm286_vm11, %v2395_v58, %v285_v32  ;;  %598 = vmatprep.mubr.f32.mxu0 %v2518_v20 }
  0xba   :  { %v368_v19 = vsel %vm3503_vm2, %v361_v17, %v292_v10  ;;  %vm678_vm2 = vcmask 1047704  }
  0xbb   :  { %v318_v40 = vsel %vm313_vm13, %v308_v44, %v2399_v63  ;;  %v319_v13 = vsel %vm313_vm13, %v2399_v63, %v2400_v2 }
  0xbc   :  { %v2191_v35 = vpack.c.bf16 %v318_v40, %v367_v22  ;;  %v2188_v49 = vpack.c.bf16 %v319_v13, %v368_v19  ;;  %v909_v40 = vld [vmem:[%s3477_s5] sm:$0xff] }
  0xbe   :  { %2190 = vmatprep.subr.msk.bf16.mxu0 %vm2774_vm1, %v2188_v49 }
  0xbf   :  { %2193 = vmatpush1.bf16.msk.msra.mxu0 %vm2774_vm1, %v2191_v35 }
  0xc2   :  { %2157 = vmatmul.mubr.msk.f32.vlgmr.msra.gmra.mrb[4].mxu0 %vm376_vm15, %v2832_v34  ;;  %v615_v34 = vrot.slane %v611_v21, %v2593_v5  ;;  %vm639_vm15 = vcmp.eq.s32.totalorder %v627_v27, 1 }
  0xc3   :  { %1054 = vmatprep.mubr.f32.mxu0 %v2518_v20 }
  0xc4   :  { %vm636_vm1 = vcmp.eq.s32.totalorder %v615_v34, 1 }
  0xc9   :  { %v374_v48 = vpop.permute.xlu0 %373 }
 0x180   :  { %v458_v29 = vpop.f32.mrb[0].mxu0 }
 0x181   :  { %v459_v53 = vadd.f32 %v458_v29, %v374_v48  ;;  %v460_v46 = vpop.f32.mrb[1].mxu0 }
 0x182   :  { %v461_v9 = vadd.f32 %v460_v46, %v374_v48 }
 0x183   :  { %v605_v44 = vmax.f32 %v459_v53, 0.0 }
 0x184   :  { %v606_v55 = vmax.f32 %v461_v9, 0.0 }
 0x185   :  { %v642_v0 = vsel %vm636_vm1, %v605_v44, 0.0  ;;  %vm3507_vm1 = vmmov %vm3506_vm3 }
 0x186   :  { %654 = vrot.lane.b32.xlu1 %v642_v0, %s2521_s28  ;;  %v643_v15 = vsel %vm637_vm9, %v606_v55, 0.0  ;;  %vm3508_vm9 = vcmask 1031168  }
 0x18a   :  { %656 = vrot.lane.b32.xlu1 %v643_v15, %s2521_s28 }
 0x18b   :  { %v529_v51 = vpop.f32.mrb[2].mxu0 }
 0x18c   :  { %v530_v52 = vadd.f32 %v529_v51, %v374_v48  ;;  %v531_v7 = vpop.f32.mrb[3].mxu0 }
 0x18d   :  { %v532_v33 = vadd.f32 %v531_v7, %v374_v48 }
 0x18e   :  { %v607_v54 = vmax.f32 %v530_v52, 0.0 }
 0x18f   :  { %v608_v11 = vmax.f32 %v532_v33, 0.0 }
 0x190   :  { %v644_v37 = vsel %vm638_vm12, %v607_v54, 0.0  ;;  %vm3509_vm12 = vmmov %vm3508_vm9 }
 0x191   :  { %658 = vrot.lane.b32.xlu0 %v644_v37, %s2521_s28  ;;  %v645_v23 = vsel %vm639_vm15, %v608_v11, 0.0  ;;  %vm3510_vm15 = vcmask 891904  }
 0x192   :  { %660 = vrot.lane.b32.xlu1 %v645_v23, %s2521_s28  ;;  %vm3511_vm14 = vmmov %vm3510_vm15 }
 0x195   :  { %v600_v30 = vpop.f32.mrb[4].mxu0 }
 0x196   :  { %v601_v57 = vadd.f32 %v600_v30, %v374_v48  ;;  %v602_v58 = vpop.f32.mrb[5].mxu0 }
 0x197   :  { %v603_v38 = vadd.f32 %v602_v58, %v374_v48 }
 0x198   :  { %v609_v45 = vmax.f32 %v601_v57, 0.0 }
 0x199   :  { %v610_v31 = vmax.f32 %v603_v38, 0.0 }
 0x19a   :  { %v646_v42 = vsel %vm640_vm6, %v609_v45, 0.0  ;;  %vm3512_vm6 = vmmov %vm3507_vm1 }
 0x19b   :  { %662 = vrot.lane.b32.xlu0 %v646_v42, %s2521_s28  ;;  %v647_v36 = vsel %vm641_vm0, %v610_v31, 0.0  ;;  %vm3513_vm0 = vmmov %vm3508_vm9 }
 0x19c   :  { %664 = vrot.lane.b32.xlu1 %v647_v36, %s2521_s28 }
 0x1f8   :  { %v655_v47 = vpop.permute.xlu1 %654 }
 0x1f9   :  { %679 = vst.msk [vmem:[#allocation2] sm:$0xff] %vm678_vm2, %v655_v47 }
 0x1fc   :  { %v657_v18 = vpop.permute.xlu1 %656 }
 0x1fd   :  { %v666_v56 = vsel %vm44_vm5, %v655_v47, %v657_v18 }
 0x200   :  { %v2969_v24 = vld [vmem:[#allocation2] sm:$0xff] }
 0x203   :  { %v659_v59 = vpop.permute.xlu0 %658 }
 0x204   :  { %v2959_v60 = vsel %vm44_vm5, %v657_v18, %v659_v59  ;;  %v661_v41 = vpop.permute.xlu1 %660 }
 0x205   :  { %v2407_v39 = vpack.i.bf16 %v2959_v60, %v666_v56  ;;  %v2967_v16 = vsel %vm44_vm5, %v659_v59, %v661_v41 }
 0x206   :  { %v2437_v32 = vpack.i.bf16 %v2967_v16, %v2969_v24 }
 0x207   :  { %2408 = vrot.lane.b32.xlu1 %v2407_v39, %s2510_s15  ;;  %2403 = vrot.lane.b32.xlu0 %v2407_v39, %s2511_s16 }
 0x20b   :  { %2418 = vrot.lane.b32.xlu1 %v2407_v39, %s2513_s18  ;;  %2413 = vrot.lane.b32.xlu0 %v2407_v39, %s2512_s17 }
 0x20d   :  { %v663_v2 = vpop.permute.xlu0 %662 }
 0x20e   :  { %v665_v61 = vpop.permute.xlu1 %664  ;;  %v2985_v63 = vsel %vm44_vm5, %v661_v41, %v663_v2 }
 0x20f   :  { %685 = vst.msk [vmem:[#allocation2 + $0x30] sm:$0xff] %vm44_vm5, %v665_v61  ;;  %2428 = vrot.lane.b32.xlu1 %v2407_v39, %s2515_s20  ;;  %2423 = vrot.lane.b32.xlu0 %v2407_v39, %s2514_s19  ;;  %v2992_v10 = vsel %vm44_vm5, %v663_v2, %v665_v61 }
 0x210   :  { %v2472_v17 = vpack.i.bf16 %v2992_v10, %v2985_v63 }
 0x213   :  { %2433 = vrot.lane.b32.xlu0 %v2407_v39, %s2516_s21  ;;  %2438 = vrot.lane.b32.xlu1 %v2437_v32, %s2511_s16 }
 0x216   :  { %v692_v62 = vld [vmem:[#allocation2 + $0x30] sm:$0xff] }
 0x217   :  { %2448 = vrot.lane.b32.xlu0 %v2437_v32, %s2512_s17  ;;  %2443 = vrot.lane.b32.xlu1 %v2437_v32, %s2510_s15  ;;  %v2477_v19 = vpack.i.bf16 %v692_v62, %v2992_v10 }
 0x21b   :  { %2458 = vrot.lane.b32.xlu0 %v2437_v32, %s2514_s19  ;;  %2453 = vrot.lane.b32.xlu1 %v2437_v32, %s2513_s18 }
 0x21f   :  { %2468 = vrot.lane.b32.xlu0 %v2437_v32, %s2516_s21  ;;  %2463 = vrot.lane.b32.xlu1 %v2437_v32, %s2515_s20 }
 0x223   :  { %760 = vrot.lane.b32.xlu0 %v2985_v63, %s2512_s17  ;;  %734 = vrot.lane.b32.xlu1 %v2985_v63, %s2510_s15 }
 0x227   :  { %812 = vrot.lane.b32.xlu0 %v2985_v63, %s2514_s19  ;;  %786 = vrot.lane.b32.xlu1 %v2985_v63, %s2513_s18 }
 0x22b   :  { %838 = vrot.lane.b32.xlu1 %v2985_v63, %s2515_s20  ;;  %2473 = vrot.lane.b32.xlu0 %v2472_v17, %s2511_s16 }
 0x22f   :  { %712 = vrot.lane.b32.xlu1 %v692_v62, %s2511_s16  ;;  %864 = vrot.lane.b32.xlu0 %v2985_v63, %s2516_s21 }
 0x233   :  { %886 = vrot.lane.b32.xlu1 %v2959_v60, %s2517_s22  ;;  %884 = vrot.lane.b32.xlu0 %v666_v56, %s2517_s22 }
 0x237   :  { %888 = vrot.lane.b32.xlu1 %v2967_v16, %s2517_s22  ;;  %882 = vrot.lane.b32.xlu0 %v2969_v24, %s2517_s22 }
 0x23b   :  { %2478 = vrot.lane.b32.xlu1 %v2477_v19, %s2510_s15  ;;  %890 = vrot.lane.b32.xlu0 %v2985_v63, %s2517_s22 }
 0x23f   :  { %2488 = vrot.lane.b32.xlu1 %v2477_v19, %s2513_s18  ;;  %2483 = vrot.lane.b32.xlu0 %v2477_v19, %s2512_s17 }
 0x243   :  { %2498 = vrot.lane.b32.xlu1 %v2477_v19, %s2515_s20  ;;  %2493 = vrot.lane.b32.xlu0 %v2477_v19, %s2514_s19 }
 0x247   :  { %892 = vrot.lane.b32.xlu1 %v2992_v10, %s2517_s22  ;;  %2503 = vrot.lane.b32.xlu0 %v2477_v19, %s2516_s21 }
 0x24b   :  { %894 = vrot.lane.b32.xlu0 %v692_v62, %s2517_s22  ;;  %912 = vperm.xlu1 %2507, %v909_v40  }
 0x279   :  { %v3028_v22 = vpop.permute.xlu0 %2403  ;;  %v3030_v13 = vpop.permute.xlu1 %2408 }
 0x27a   :  { %v2406_v35 = vunpack.i.h.bf16 %v3028_v22  ;;  %v2405_v49 = vunpack.i.l.bf16 %v3028_v22  ;;  %v2411_v44 = vunpack.i.h.bf16 %v3030_v13  ;;  %v2410_v55 = vunpack.i.l.bf16 %v3030_v13 }
 0x27c   :  { %v715_v21 = vsel %vm3506_vm3, %v2405_v49, %v2406_v35  ;;  %v741_v8 = vsel %vm3508_vm9, %v2410_v55, %v2411_v44  ;;  %vm3514_vm3 = vmmov %vm3507_vm1 }
 0x27d   :  { %v3037_v48 = vpop.permute.xlu0 %2413  ;;  %v3039_v34 = vpop.permute.xlu1 %2418  ;;  %v2194_v28 = vpack.c.bf16 %v715_v21, %v666_v56  ;;  %vm3516_vm9 = vmmov %vm3511_vm14 }
 0x27e   :  { %v2416_v46 = vunpack.i.h.bf16 %v3037_v48  ;;  %v2415_v9 = vunpack.i.l.bf16 %v3037_v48  ;;  %v2421_v33 = vunpack.i.h.bf16 %v3039_v34  ;;  %v2420_v54 = vunpack.i.l.bf16 %v3039_v34  ;;  %v3151_v34 = vld [vmem:[%s3478_s4] sm:$0xff]  ;;  %s2522_s4 = smov 18  }
 0x27f   :  { %2195 = vmatprep.subr.bf16.mxu1 %v2194_v28 }
 0x280   :  { %v767_v52 = vsel %vm178_vm4, %v2415_v9, %v2416_v46  ;;  %v793_v39 = vsel %vm3510_vm15, %v2420_v54, %v2421_v33  ;;  %vm3518_vm15 = vmmov %vm3514_vm3 }
 0x281   :  { %v3041_v29 = vpop.permute.xlu0 %2423  ;;  %v3043_v53 = vpop.permute.xlu1 %2428  ;;  %v2198_v57 = vpack.c.bf16 %v767_v52, %v741_v8 }
 0x282   :  { %v2426_v27 = vunpack.i.h.bf16 %v3041_v29  ;;  %v2425_v51 = vunpack.i.l.bf16 %v3041_v29  ;;  %v2431_v36 = vunpack.i.h.bf16 %v3043_v53  ;;  %v2430_v47 = vunpack.i.l.bf16 %v3043_v53 }
 0x284   :  { %v819_v45 = vsel %vm232_vm7, %v2425_v51, %v2426_v27 }
 0x285   :  { %v3049_v0 = vpop.permute.xlu0 %2433  ;;  %v3051_v15 = vpop.permute.xlu1 %2438 }
 0x286   :  { %v2440_v50 = vunpack.i.l.bf16 %v3051_v15  ;;  %v2436_v58 = vunpack.i.h.bf16 %v3049_v0  ;;  %v2435_v38 = vunpack.i.l.bf16 %v3049_v0  ;;  %v2441_v8 = vunpack.i.h.bf16 %v3051_v15 }
 0x288   :  { %v714_v7 = vsel %vm3507_vm1, %v2440_v50, %v2405_v49  ;;  %v871_v32 = vsel %vm286_vm11, %v2435_v38, %v2436_v58  ;;  %v845_v49 = vsel %vm259_vm10, %v2430_v47, %v2431_v36  ;;  %vm3515_vm1 = vmmov %vm3513_vm0 }
 0x289   :  { %v3062_v11 = vpop.permute.xlu0 %2448  ;;  %v3064_v37 = vpop.permute.xlu1 %2443  ;;  %v2196_v23 = vpack.c.bf16 %v714_v7, %v2969_v24  ;;  %v2202_v24 = vpack.c.bf16 %v819_v45, %v793_v39 }
 0x28a   :  { %v2450_v26 = vunpack.i.l.bf16 %v3062_v11  ;;  %v2445_v30 = vunpack.i.l.bf16 %v3064_v37  ;;  %v2446_v45 = vunpack.i.h.bf16 %v3064_v37 }
 0x28b   :  { %2197 = vmatpush1.bf16.msra.mxu1 %v2196_v23 }
 0x28c   :  { %2199 = vmatprep.subr.bf16.mxu1 %v2198_v57  ;;  %v740_v31 = vsel %vm3509_vm12, %v2445_v30, %v2410_v55  ;;  %v766_v42 = vsel %vm178_vm4, %v2450_v26, %v2415_v9  ;;  %v2206_v9 = vpack.c.bf16 %v871_v32, %v845_v49  ;;  %v2451_v57 = vunpack.i.h.bf16 %v3062_v11  ;;  %vm3517_vm12 = vmmov %vm3516_vm9 }
 0x28d   :  { %v2459_v18 = vpop.permute.xlu0 %2458  ;;  %v2454_v59 = vpop.permute.xlu1 %2453  ;;  %v2200_v56 = vpack.c.bf16 %v766_v42, %v740_v31  ;;  %v716_v31 = vsel %vm3512_vm6, %v2406_v35, %v2441_v8  ;;  %v742_v35 = vsel %vm3515_vm1, %v2411_v44, %v2446_v45  ;;  %vm915_vm6 = vcmask 588800   ;;  %vm3521_vm1 = vmmov %vm3516_vm9 }
 0x28e   :  { %v2460_v41 = vunpack.i.l.bf16 %v2459_v18  ;;  %v2455_v61 = vunpack.i.l.bf16 %v2454_v59  ;;  %v2212_v37 = vpack.c.bf16 %v716_v31, %v2959_v60  ;;  %v768_v22 = vsel %vm178_vm4, %v2416_v46, %v2451_v57 }
 0x28f   :  { %2201 = vmatpush1.bf16.msra.mxu1 %v2200_v56  ;;  %v2216_v48 = vpack.c.bf16 %v768_v22, %v742_v35 }
 0x290   :  { %2203 = vmatprep.subr.bf16.mxu1 %v2202_v24  ;;  %v792_v2 = vsel %vm3511_vm14, %v2455_v61, %v2420_v54  ;;  %v818_v17 = vsel %vm232_vm7, %v2460_v41, %v2425_v51  ;;  %v2461_v41 = vunpack.i.h.bf16 %v2459_v18  ;;  %v2456_v61 = vunpack.i.h.bf16 %v2454_v59  ;;  %vm3519_vm14 = vmmov %vm3514_vm3 }
 0x291   :  { %v3089_v62 = vpop.permute.xlu0 %2468  ;;  %v3091_v19 = vpop.permute.xlu1 %2463  ;;  %v2204_v40 = vpack.c.bf16 %v818_v17, %v792_v2 }
 0x292   :  { %v2470_v21 = vunpack.i.l.bf16 %v3089_v62  ;;  %v2465_v28 = vunpack.i.l.bf16 %v3091_v19  ;;  %v2471_v46 = vunpack.i.h.bf16 %v3089_v62  ;;  %v820_v44 = vsel %vm232_vm7, %v2426_v27, %v2461_v41 }
 0x293   :  { %2205 = vmatpush1.bf16.msra.mxu1 %v2204_v40  ;;  %v794_v2 = vsel %vm3517_vm12, %v2421_v33, %v2456_v61  ;;  %v2466_v17 = vunpack.i.h.bf16 %v3091_v19 }
 0x294   :  { %2207 = vmatprep.subr.bf16.mxu1 %v2206_v9  ;;  %v844_v55 = vsel %vm259_vm10, %v2465_v28, %v2430_v47  ;;  %v870_v50 = vsel %vm286_vm11, %v2470_v21, %v2435_v38  ;;  %v2220_v27 = vpack.c.bf16 %v820_v44, %v794_v2  ;;  %v872_v9 = vsel %vm286_vm11, %v2436_v58, %v2471_v46 }
 0x295   :  { %v3100_v51 = vpop.permute.xlu0 %760  ;;  %v3102_v52 = vpop.permute.xlu1 %734  ;;  %v2208_v7 = vpack.c.bf16 %v870_v50, %v844_v55  ;;  %v846_v55 = vsel %vm259_vm10, %v2431_v36, %v2466_v17 }
 0x296   :  { %v769_v42 = vsel %vm178_vm4, %v2451_v57, %v3100_v51  ;;  %v743_v47 = vsel %vm3513_vm0, %v2446_v45, %v3102_v52  ;;  %v2224_v0 = vpack.c.bf16 %v872_v9, %v846_v55 }
 0x297   :  { %2209 = vmatpush1.bf16.msra.mxu1 %v2208_v7  ;;  %v2214_v24 = vpack.c.bf16 %v769_v42, %v743_v47 }
 0x299   :  { %v3104_v54 = vpop.permute.xlu0 %812  ;;  %v3106_v23 = vpop.permute.xlu1 %786 }
 0x29a   :  { %v821_v32 = vsel %vm232_vm7, %v2461_v41, %v3104_v54 }
 0x29d   :  { %v2474_v26 = vpop.permute.xlu0 %2473  ;;  %v3109_v30 = vpop.permute.xlu1 %838 }
 0x29e   :  { %v2475_v38 = vunpack.i.l.bf16 %v2474_v26  ;;  %v2476_v60 = vunpack.i.h.bf16 %v2474_v26  ;;  %v847_v33 = vsel %vm259_vm10, %v2466_v17, %v3109_v30 }
 0x2a0   :  { %v717_v15 = vsel %vm3514_vm3, %v2441_v8, %v2475_v38  ;;  %v718_v62 = vsel %vm3519_vm14, %v2475_v38, %v2476_v60  ;;  %vm3520_vm3 = vmmov %vm3513_vm0 }
 0x2a1   :  { %v3121_v56 = vpop.permute.xlu0 %864  ;;  %v713_v39 = vpop.permute.xlu1 %712  ;;  %v2210_v11 = vpack.c.bf16 %v717_v15, %v2967_v16  ;;  %v795_v16 = vsel %vm3516_vm9, %v2456_v61, %v3106_v23  ;;  %v2228_v8 = vpack.c.bf16 %v718_v62, %v2985_v63  ;;  %vm3522_vm9 = vmmov %vm3521_vm1 }
 0x2a2   :  { %v2218_v40 = vpack.c.bf16 %v821_v32, %v795_v16  ;;  %v873_v49 = vsel %vm286_vm11, %v2471_v46, %v3121_v56  ;;  %v719_v21 = vsel %vm3518_vm15, %v2476_v60, %v713_v39 }
 0x2a3   :  { %2211 = vmatprep.subr.bf16.mxu0 %v2210_v11  ;;  %v2222_v50 = vpack.c.bf16 %v873_v49, %v847_v33  ;;  %v2226_v7 = vpack.c.bf16 %v719_v21, %v2992_v10 }
 0x2a4   :  { %2213 = vmatpush1.bf16.msra.mxu0 %v2212_v37 }
 0x2a5   :  { %v885_v18 = vpop.permute.xlu0 %884  ;;  %v887_v59 = vpop.permute.xlu1 %886  ;;  %2215 = vmatprep.subr.bf16.mxu0 %v2214_v24 }
 0x2a6   :  { %v897_v13 = vsel %vm313_vm13, %v885_v18, %v887_v59 }
 0x2a7   :  { %935 = vmatprep.subr.mxu1 %v897_v13 }
 0x2a8   :  { %2217 = vmatpush1.bf16.msra.mxu0 %v2216_v48 }
 0x2a9   :  { %v883_v28 = vpop.permute.xlu0 %882  ;;  %v889_v29 = vpop.permute.xlu1 %888  ;;  %2219 = vmatprep.subr.bf16.mxu0 %v2218_v40 }
 0x2aa   :  { %v896_v19 = vsel %vm313_vm13, %v883_v28, %v885_v18  ;;  %v898_v31 = vsel %vm313_vm13, %v887_v59, %v889_v29 }
 0x2ab   :  { %936 = vmatpush1.msra.mxu1 %v896_v19 }
 0x2ac   :  { %2158 = vmatmul.mubr.msk.f32.vlgmr.msra.gmra.mrb[0].mxu1 %vm915_vm6, %v3151_v34  ;;  %2221 = vmatpush1.bf16.msra.mxu0 %v2220_v27 }
 0x2ad   :  { %2227 = vmatprep.subr.bf16.mxu1 %v2226_v7  ;;  %v891_v26 = vpop.permute.xlu0 %890  ;;  %v2479_v57 = vpop.permute.xlu1 %2478  ;;  %2223 = vmatprep.subr.bf16.mxu0 %v2222_v50 }
 0x2ae   :  { %2229 = vmatpush1.bf16.msra.mxu1 %v2228_v8  ;;  %1125 = vmatprep.mubr.f32.mxu1 %v2518_v20  ;;  %v2481_v53 = vunpack.i.h.bf16 %v2479_v57  ;;  %v2480_v58 = vunpack.i.l.bf16 %v2479_v57  ;;  %v899_v10 = vsel %vm313_vm13, %v889_v29, %v891_v26 }
 0x2b0   :  { %2225 = vmatpush1.bf16.msra.mxu0 %v2224_v0  ;;  %v744_v15 = vsel %vm3513_vm0, %v3102_v52, %v2480_v58  ;;  %v745_v11 = vsel %vm3520_vm3, %v2480_v58, %v2481_v53 }
 0x2b1   :  { %v2484_v36 = vpop.permute.xlu0 %2483  ;;  %v2489_v45 = vpop.permute.xlu1 %2488  ;;  %1006 = vmatprep.subr.mxu0 %v899_v10 }
 0x2b2   :  { %v2486_v63 = vunpack.i.h.bf16 %v2484_v36  ;;  %v2485_v38 = vunpack.i.l.bf16 %v2484_v36  ;;  %v2491_v42 = vunpack.i.h.bf16 %v2489_v45  ;;  %v2490_v47 = vunpack.i.l.bf16 %v2489_v45 }
 0x2b4   :  { %v770_v39 = vsel %vm178_vm4, %v3100_v51, %v2485_v38  ;;  %1007 = vmatpush1.msra.mxu0 %v898_v31  ;;  %v771_v37 = vsel %vm178_vm4, %v2485_v38, %v2486_v63  ;;  %v796_v52 = vsel %vm3521_vm1, %v3106_v23, %v2490_v47  ;;  %v797_v51 = vsel %vm3522_vm9, %v2490_v47, %v2491_v42 }
 0x2b5   :  { %v2232_v41 = vpack.c.bf16 %v770_v39, %v744_v15  ;;  %v2494_v61 = vpop.permute.xlu0 %2493  ;;  %v2499_v22 = vpop.permute.xlu1 %2498  ;;  %2159 = vmatmul.mubr.msk.f32.vlgmr.msra.gmra.mrb[6].mxu0 %vm915_vm6, %v3151_v34  ;;  %v2230_v35 = vpack.c.bf16 %v771_v37, %v745_v11  ;;  %vm3523_vm1 = vcmask 1039360  }
 0x2b6   :  { %v2496_v24 = vunpack.i.h.bf16 %v2494_v61  ;;  %v2495_v32 = vunpack.i.l.bf16 %v2494_v61  ;;  %1613 = vmatprep.mubr.f32.mxu0 %v2518_v20  ;;  %v2501_v60 = vunpack.i.h.bf16 %v2499_v22  ;;  %v2500_v18 = vunpack.i.l.bf16 %v2499_v22  ;;  %vm3524_vm9 = vmmov %vm3523_vm1 }
 0x2b7   :  { %2231 = vmatprep.subr.bf16.mxu1 %v2230_v35 }
 0x2b8   :  { %v822_v16 = vsel %vm232_vm7, %v3104_v54, %v2495_v32  ;;  %2233 = vmatpush1.bf16.msra.mxu1 %v2232_v41  ;;  %v823_v59 = vsel %vm232_vm7, %v2495_v32, %v2496_v24  ;;  %v848_v23 = vsel %vm259_vm10, %v3109_v30, %v2500_v18  ;;  %v849_v54 = vsel %vm259_vm10, %v2500_v18, %v2501_v60 }
 0x2b9   :  { %v2236_v48 = vpack.c.bf16 %v822_v16, %v796_v52  ;;  %v2504_v46 = vpop.permute.xlu0 %2503  ;;  %v2234_v13 = vpack.c.bf16 %v823_v59, %v797_v51  ;;  %v893_v28 = vpop.permute.xlu1 %892  ;;  %vm1233_vm10 = vcmask 146432  }
 0x2ba   :  { %v2506_v44 = vunpack.i.h.bf16 %v2504_v46  ;;  %v2505_v2 = vunpack.i.l.bf16 %v2504_v46  ;;  %v900_v27 = vsel %vm313_vm13, %v891_v26, %v893_v28 }
 0x2bb   :  { %2235 = vmatprep.subr.bf16.mxu1 %v2234_v13 }
 0x2bc   :  { %v874_v17 = vsel %vm286_vm11, %v3121_v56, %v2505_v2  ;;  %2237 = vmatpush1.bf16.msra.mxu1 %v2236_v48  ;;  %v875_v40 = vsel %vm286_vm11, %v2505_v2, %v2506_v44 }
 0x2bd   :  { %v2240_v49 = vpack.c.bf16 %v874_v17, %v848_v23  ;;  %v895_v21 = vpop.permute.xlu0 %894  ;;  %v2238_v62 = vpack.c.bf16 %v875_v40, %v849_v54 }
 0x2be   :  { %v901_v29 = vsel %vm313_vm13, %v893_v28, %v895_v21 }
 0x2bf   :  { %2239 = vmatprep.subr.bf16.mxu1 %v2238_v62  ;;  %v3254_v62 = vld [vmem:[%s3476_s1 + $0x2] ss:$4 sm:$0x3f] }
 0x2c0   :  { %2241 = vmatpush1.bf16.msra.mxu1 %v2240_v49  ;;  %vm43_vm13 = vcmp.ne.f32.partialorder %v3254_v62, 0.0 }
 0x2c1   :  { %1077 = vmatprep.subr.mxu1 %v901_v29  ;;  %v1253_v28 = vsel %vm43_vm13, 1, %v3505_v25 }
 0x2c4   :  { %1078 = vmatpush1.msra.mxu1 %v900_v27 }
 0x2c5   :  { %2160 = vmatmul.mubr.msk.f32.vlgmr.msra.gmra.mrb[2].mxu1 %vm915_vm6, %v3151_v34 }
 0x2c6   :  { %1702 = vmatprep.mubr.f32.mxu1 %v2518_v20 }
 0x2ca   :  { %v913_v30 = vpop.permute.xlu1 %912 }
 0x37f   :  { %v985_v56 = vpop.f32.mrb[0].mxu1 }
 0x380   :  { %v987_v33 = vpop.f32.mrb[1].mxu1  ;;  %v986_v19 = vadd.f32 %v985_v56, %v913_v30 }
 0x381   :  { %v988_v9 = vadd.f32 %v987_v33, %v913_v30 }
 0x382   :  { %v3195_v55 = vmax.f32 %v986_v19, 0.0 }
 0x383   :  { %v3197_v50 = vmax.f32 %v988_v9, 0.0 }
 0x384   :  { %1144 = vrot.lane.b32.xlu0 %v3195_v55, %s2521_s28 }
 0x385   :  { %1146 = vrot.lane.b32.xlu1 %v3197_v50, %s2521_s28 }
 0x388   :  { %v1056_v7 = vpop.f32.mrb[6].mxu0 }
 0x389   :  { %v1057_v8 = vadd.f32 %v1056_v7, %v913_v30  ;;  %v1058_v34 = vpop.f32.mrb[7].mxu0 }
 0x38a   :  { %v1059_v26 = vadd.f32 %v1058_v34, %v913_v30 }
 0x38b   :  { %v3203_v57 = vmax.f32 %v1057_v8, 0.0  ;;  %v1261_v8 = vrot.slane %v1253_v28, %v2587_v3 }
 0x38c   :  { %v3205_v0 = vmax.f32 %v1059_v26, 0.0 }
 0x38d   :  { %1148 = vrot.lane.b32.xlu0 %v3203_v57, %s2521_s28  ;;  %vm1279_vm15 = vcmp.eq.s32.totalorder %v1261_v8, 1 }
 0x38e   :  { %1150 = vrot.lane.b32.xlu1 %v3205_v0, %s2521_s28 }
 0x391   :  { %1221 = vrot.lane.b32.xlu0 %v3195_v55, %s2522_s4 }
 0x392   :  { %1223 = vrot.lane.b32.xlu1 %v3197_v50, %s2522_s4 }
 0x395   :  { %1225 = vrot.lane.b32.xlu0 %v3203_v57, %s2522_s4 }
 0x396   :  { %1227 = vrot.lane.b32.xlu1 %v3205_v0, %s2522_s4 }
 0x398   :  { %v1127_v53 = vpop.f32.mrb[2].mxu1 }
 0x399   :  { %v1128_v58 = vadd.f32 %v1127_v53, %v913_v30  ;;  %v1129_v10 = vpop.f32.mrb[3].mxu1 }
 0x39a   :  { %v1130_v36 = vadd.f32 %v1129_v10, %v913_v30  ;;  %v1257_v30 = vrot.slane %v1253_v28, %v2593_v5 }
 0x39b   :  { %v3215_v45 = vmax.f32 %v1128_v58, 0.0  ;;  %v1265_v58 = vrot.slane %v1253_v28, %v2590_v4 }
 0x39c   :  { %v3217_v63 = vmax.f32 %v1130_v36, 0.0  ;;  %vm1278_vm12 = vcmp.eq.s32.totalorder %v1257_v30, 1 }
 0x39d   :  { %1152 = vrot.lane.b32.xlu0 %v3215_v45, %s2521_s28  ;;  %vm1280_vm14 = vcmp.eq.s32.totalorder %v1265_v58, 1 }
 0x39e   :  { %1154 = vrot.lane.b32.xlu1 %v3217_v63, %s2521_s28 }
 0x3a1   :  { %1229 = vrot.lane.b32.xlu0 %v3215_v45, %s2522_s4 }
 0x3a2   :  { %1231 = vrot.lane.b32.xlu1 %v3217_v63, %s2522_s4 }
 0x3f6   :  { %v1145_v38 = vpop.permute.xlu0 %1144 }
 0x3f7   :  { %v1147_v31 = vpop.permute.xlu1 %1146  ;;  %1168 = vst.msk [vmem:[#allocation2] sm:$0xff] %vm678_vm2, %v1145_v38 }
 0x3f8   :  { %v1156_v42 = vsel %vm44_vm5, %v1145_v38, %v1147_v31 }
 0x3f9   :  { %1191 = vrot.lane.b32.xlu1 %v1156_v42, %s2514_s19 }
 0x3fe   :  { %v1175_v47 = vld [vmem:[#allocation2] sm:$0xff] }
 0x3ff   :  { %v1149_v15 = vpop.permute.xlu0 %1148  ;;  %1189 = vrot.lane.b32.xlu0 %v1175_v47, %s2514_s19 }
 0x400   :  { %v1151_v39 = vpop.permute.xlu1 %1150  ;;  %v1157_v32 = vsel %vm44_vm5, %v1147_v31, %v1149_v15 }
 0x401   :  { %v1158_v51 = vsel %vm44_vm5, %v1149_v15, %v1151_v39 }
 0x403   :  { %v1222_v11 = vpop.permute.xlu0 %1221 }
 0x404   :  { %v1246_v37 = vmax.f32 %v1175_v47, %v1222_v11  ;;  %v1224_v41 = vpop.permute.xlu1 %1223 }
 0x405   :  { %v1234_v61 = vsel %vm1233_vm10, %v1222_v11, %v1224_v41 }
 0x406   :  { %v1247_v22 = vmax.f32 %v1156_v42, %v1234_v61  ;;  %1291 = vrot.lane.b32.xlu0 %v1246_v37, %s2512_s17 }
 0x407   :  { %v1226_v35 = vpop.permute.xlu0 %1225 }
 0x408   :  { %v1228_v24 = vpop.permute.xlu1 %1227  ;;  %1293 = vrot.lane.b32.xlu1 %v1247_v22, %s2512_s17  ;;  %v1235_v52 = vsel %vm1233_vm10, %v1224_v41, %v1226_v35 }
 0x409   :  { %v1236_v16 = vsel %vm1233_vm10, %v1226_v35, %v1228_v24  ;;  %v1248_v60 = vmax.f32 %v1157_v32, %v1235_v52  ;;  %v1273_v35 = vrot.slane %v1253_v28, %v2603_v12 }
 0x40a   :  { %1193 = vrot.lane.b32.xlu0 %v1157_v32, %s2514_s19  ;;  %v1249_v18 = vmax.f32 %v1158_v51, %v1236_v16 }
 0x40b   :  { %vm1282_vm0 = vcmp.eq.s32.totalorder %v1273_v35, 1  ;;  %v3355_v35 = vld [vmem:[%s3476_s1 + $0x1] ss:$4 sm:$0x3f] }
 0x40c   :  { %1195 = vrot.lane.b32.xlu1 %v1158_v51, %s2514_s19 }
 0x40e   :  { %1295 = vrot.lane.b32.xlu0 %v1248_v60, %s2512_s17 }
 0x40f   :  { %v1153_v59 = vpop.permute.xlu0 %1152 }
 0x410   :  { %v1159_v48 = vsel %vm44_vm5, %v1151_v39, %v1153_v59  ;;  %v1155_v46 = vpop.permute.xlu1 %1154  ;;  %1297 = vrot.lane.b32.xlu1 %v1249_v18, %s2512_s17 }
 0x411   :  { %1174 = vst.msk [vmem:[#allocation2 + $0x30] sm:$0xff] %vm44_vm5, %v1155_v46  ;;  %v1160_v13 = vsel %vm44_vm5, %v1153_v59, %v1155_v46 }
 0x412   :  { %1197 = vrot.lane.b32.xlu0 %v1159_v48, %s2514_s19 }
 0x413   :  { %v1230_v44 = vpop.permute.xlu0 %1229 }
 0x414   :  { %v1237_v2 = vsel %vm1233_vm10, %v1228_v24, %v1230_v44  ;;  %1199 = vrot.lane.b32.xlu1 %v1160_v13, %s2514_s19  ;;  %v1232_v23 = vpop.permute.xlu1 %1231  ;;  %v1277_v24 = vrot.slane %v1253_v28, %v2608_v14 }
 0x415   :  { %v1250_v17 = vmax.f32 %v1159_v48, %v1237_v2  ;;  %v1238_v40 = vsel %vm1233_vm10, %v1230_v44, %v1232_v23  ;;  %vm1536_vm10 = vcmask 64512  }
 0x416   :  { %v1251_v21 = vmax.f32 %v1160_v13, %v1238_v40  ;;  %vm1283_vm3 = vcmp.eq.s32.totalorder %v1277_v24, 1 }
 0x418   :  { %v1181_v54 = vld [vmem:[#allocation2 + $0x30] sm:$0xff]  ;;  %1299 = vrot.lane.b32.xlu1 %v1250_v17, %s2512_s17 }
 0x419   :  { %v1252_v49 = vmax.f32 %v1181_v54, %v1232_v23  ;;  %1201 = vrot.lane.b32.xlu0 %v1181_v54, %s2514_s19 }
 0x41c   :  { %1303 = vrot.lane.b32.xlu1 %v1252_v49, %s2512_s17 }
 0x41d   :  { %1301 = vrot.lane.b32.xlu0 %v1251_v21, %s2512_s17 }
 0x46b   :  { %v1192_v29 = vpop.permute.xlu1 %1191 }
 0x471   :  { %v1190_v27 = vpop.permute.xlu0 %1189 }
 0x472   :  { %v1203_v56 = vsel %vm232_vm7, %v1190_v27, %v1192_v29 }
 0x473   :  { %v1215_v19 = vmax.f32 %v3195_v55, %v1203_v56 }
 0x478   :  { %v1292_v33 = vpop.permute.xlu0 %1291 }
 0x47a   :  { %v1294_v9 = vpop.permute.xlu1 %1293 }
 0x47b   :  { %v1305_v7 = vsel %vm178_vm4, %v1292_v33, %v1294_v9 }
 0x47c   :  { %v1194_v34 = vpop.permute.xlu0 %1193  ;;  %v3265_v26 = vsel %vm1278_vm12, %v1215_v19, %v1305_v7 }
 0x47d   :  { %v1204_v53 = vsel %vm232_vm7, %v1192_v29, %v1194_v34  ;;  %1329 = vrot.lane.b32.xlu0 %v3265_v26, %s2521_s28 }
 0x47e   :  { %v1196_v10 = vpop.permute.xlu1 %1195  ;;  %v1216_v55 = vmax.f32 %v3197_v50, %v1204_v53  ;;  %v1269_v50 = vrot.slane %v1253_v28, %v2596_v6 }
 0x47f   :  { %v1205_v36 = vsel %vm232_vm7, %v1194_v34, %v1196_v10 }
 0x480   :  { %v1296_v38 = vpop.permute.xlu0 %1295  ;;  %v1217_v42 = vmax.f32 %v3203_v57, %v1205_v36  ;;  %vm1281_vm6 = vcmp.eq.s32.totalorder %v1269_v50, 1 }
 0x481   :  { %v1306_v31 = vsel %vm178_vm4, %v1294_v9, %v1296_v38 }
 0x482   :  { %v1298_v47 = vpop.permute.xlu1 %1297  ;;  %v3275_v15 = vsel %vm1279_vm15, %v1216_v55, %v1306_v31  ;;  %vm3525_vm15 = vmmov %vm3523_vm1 }
 0x483   :  { %v1307_v39 = vsel %vm178_vm4, %v1296_v38, %v1298_v47  ;;  %1331 = vrot.lane.b32.xlu1 %v3275_v15, %s2521_s28 }
 0x484   :  { %v3280_v11 = vsel %vm1280_vm14, %v1217_v42, %v1307_v39  ;;  %v1198_v37 = vpop.permute.xlu0 %1197 }
 0x485   :  { %1333 = vrot.lane.b32.xlu0 %v3280_v11, %s2521_s28  ;;  %v1206_v57 = vsel %vm232_vm7, %v1196_v10, %v1198_v37 }
 0x486   :  { %v1200_v41 = vpop.permute.xlu1 %1199  ;;  %v1218_v61 = vmax.f32 %v3205_v0, %v1206_v57 }
 0x487   :  { %1406 = vrot.lane.b32.xlu1 %v3265_v26, %s2523_s14  ;;  %v1207_v51 = vsel %vm232_vm7, %v1198_v37, %v1200_v41  ;;  %v1512_v37 = vld [vmem:[%s3479_s7] sm:$0xff] }
 0x488   :  { %v1219_v18 = vmax.f32 %v3215_v45, %v1207_v51 }
 0x489   :  { %1408 = vrot.lane.b32.xlu0 %v3275_v15, %s2523_s14 }
 0x48a   :  { %v1300_v22 = vpop.permute.xlu1 %1299 }
 0x48b   :  { %1410 = vrot.lane.b32.xlu1 %v3280_v11, %s2523_s14  ;;  %v1202_v32 = vpop.permute.xlu0 %1201  ;;  %v1308_v52 = vsel %vm178_vm4, %v1298_v47, %v1300_v22 }
 0x48c   :  { %v1208_v16 = vsel %vm232_vm7, %v1200_v41, %v1202_v32  ;;  %v3295_v60 = vsel %vm1281_vm6, %v1218_v61, %v1308_v52  ;;  %v1514_v41 = vld [vmem:[%s3479_s7 + $0x10] sm:$0xff]  ;;  %v1513_v61 = vld [vmem:[%s3479_s7 + $0x8] sm:$0xff]  ;;  %vm40_vm7 = vcmp.ne.f32.partialorder %v3355_v35, 0.0  ;;  %vm3526_vm6 = vmmov %vm3523_vm1 }
 0x48d   :  { %1335 = vrot.lane.b32.xlu0 %v3295_v60, %s2521_s28  ;;  %v1220_v59 = vmax.f32 %v3217_v63, %v1208_v16  ;;  %v3361_v32 = vsel %vm40_vm7, 1, %v3505_v25 }
 0x48e   :  { %v1304_v0 = vpop.permute.xlu1 %1303  ;;  %v1446_v16 = vrot.slane %v3361_v32, %v2587_v3 }
 0x48f   :  { %v1302_v48 = vpop.permute.xlu0 %1301 }
 0x490   :  { %v1309_v46 = vsel %vm178_vm4, %v1300_v22, %v1302_v48  ;;  %v1310_v13 = vsel %vm178_vm4, %v1302_v48, %v1304_v0  ;;  %vm1418_vm4 = vcmask 7168   ;;  %v1515_v22 = vld [vmem:[%s3479_s7 + $0x18] sm:$0xff]  ;;  %v1442_v0 = vrot.slane %v3361_v32, %v2593_v5  ;;  %v1508_v5 = vld [vmem:[%s3480_s6] sm:$0xff] }
 0x491   :  { %v3303_v44 = vsel %vm1282_vm0, %v1219_v18, %v1309_v46  ;;  %v3305_v2 = vsel %vm1283_vm3, %v1220_v59, %v1310_v13  ;;  %vm3527_vm3 = vmmov %vm3523_vm1 }
 0x492   :  { %1337 = vrot.lane.b32.xlu1 %v3303_v44, %s2521_s28  ;;  %1339 = vrot.lane.b32.xlu0 %v3305_v2, %s2521_s28 }
 0x496   :  { %1412 = vrot.lane.b32.xlu1 %v3295_v60, %s2523_s14  ;;  %1414 = vrot.lane.b32.xlu0 %v3303_v44, %s2523_s14 }
 0x49a   :  { %1416 = vrot.lane.b32.xlu1 %v3305_v2, %s2523_s14 }
 0x4ef   :  { %v1330_v45 = vpop.permute.xlu0 %1329 }
 0x4f0   :  { %1353 = vst.msk [vmem:[#allocation2] sm:$0xff] %vm678_vm2, %v1330_v45  ;;  %vm1463_vm2 = vcmp.eq.s32.totalorder %v1442_v0, 1 }
 0x4f5   :  { %v1332_v63 = vpop.permute.xlu1 %1331 }
 0x4f6   :  { %v1341_v23 = vsel %vm44_vm5, %v1330_v45, %v1332_v63 }
 0x4f7   :  { %v1334_v17 = vpop.permute.xlu0 %1333  ;;  %v1360_v54 = vld [vmem:[#allocation2] sm:$0xff] }
 0x4f8   :  { %v1342_v40 = vsel %vm44_vm5, %v1332_v63, %v1334_v17  ;;  %1374 = vrot.lane.b32.xlu0 %v1360_v54, %s2516_s21 }
 0x4f9   :  { %v1407_v49 = vpop.permute.xlu1 %1406 }
 0x4fa   :  { %v1431_v21 = vmax.f32 %v1360_v54, %v1407_v49 }
 0x4fb   :  { %v1409_v28 = vpop.permute.xlu0 %1408 }
 0x4fc   :  { %1476 = vrot.lane.b32.xlu1 %v1431_v21, %s2511_s16  ;;  %1376 = vrot.lane.b32.xlu0 %v1341_v23, %s2516_s21  ;;  %v1419_v30 = vsel %vm1418_vm4, %v1407_v49, %v1409_v28  ;;  %v1510_v49 = vld [vmem:[%s3480_s6 + $0x10] sm:$0xff]  ;;  %v1454_v21 = vrot.slane %v3361_v32, %v2596_v6  ;;  %v1462_v6 = vrot.slane %v3361_v32, %v2608_v14 }
 0x4fd   :  { %v1411_v29 = vpop.permute.xlu1 %1410  ;;  %v1432_v9 = vmax.f32 %v1341_v23, %v1419_v30  ;;  %v1511_v30 = vld [vmem:[%s3480_s6 + $0x18] sm:$0xff] }
 0x4fe   :  { %v1420_v27 = vsel %vm1418_vm4, %v1409_v28, %v1411_v29  ;;  %vm1466_vm12 = vcmp.eq.s32.totalorder %v1454_v21, 1  ;;  %vm1468_vm0 = vcmp.eq.s32.totalorder %v1462_v6, 1 }
 0x4ff   :  { %v1433_v56 = vmax.f32 %v1342_v40, %v1420_v27  ;;  %v1336_v33 = vpop.permute.xlu0 %1335 }
 0x500   :  { %1378 = vrot.lane.b32.xlu1 %v1342_v40, %s2516_s21  ;;  %v1343_v19 = vsel %vm44_vm5, %v1334_v17, %v1336_v33 }
 0x501   :  { %1480 = vrot.lane.b32.xlu0 %v1433_v56, %s2511_s16 }
 0x504   :  { %1478 = vrot.lane.b32.xlu1 %v1432_v9, %s2511_s16  ;;  %v1338_v7 = vpop.permute.xlu1 %1337  ;;  %v1340_v8 = vpop.permute.xlu0 %1339 }
 0x505   :  { %v1344_v34 = vsel %vm44_vm5, %v1336_v33, %v1338_v7  ;;  %v1345_v53 = vsel %vm44_vm5, %v1338_v7, %v1340_v8  ;;  %1359 = vst.msk [vmem:[#allocation2 + $0x30] sm:$0xff] %vm44_vm5, %v1340_v8  ;;  %1380 = vrot.lane.b32.xlu0 %v1343_v19, %s2516_s21  ;;  %vm1464_vm5 = vcmp.eq.s32.totalorder %v1446_v16, 1  ;;  %v1458_v7 = vrot.slane %v3361_v32, %v2603_v12 }
 0x508   :  { %v1413_v58 = vpop.permute.xlu1 %1412  ;;  %v1415_v55 = vpop.permute.xlu0 %1414 }
 0x509   :  { %v1421_v10 = vsel %vm1418_vm4, %v1411_v29, %v1413_v58  ;;  %1384 = vrot.lane.b32.xlu0 %v1345_v53, %s2516_s21  ;;  %v1422_v39 = vsel %vm1418_vm4, %v1413_v58, %v1415_v55  ;;  %v1450_v29 = vrot.slane %v3361_v32, %v2590_v4 }
 0x50a   :  { %v1434_v36 = vmax.f32 %v1343_v19, %v1421_v10  ;;  %v1435_v50 = vmax.f32 %v1344_v34, %v1422_v39 }
 0x50b   :  { %vm1465_vm14 = vcmp.eq.s32.totalorder %v1450_v29, 1 }
 0x50c   :  { %v1417_v38 = vpop.permute.xlu1 %1416  ;;  %v1366_v31 = vld [vmem:[#allocation2 + $0x30] sm:$0xff] }
 0x50d   :  { %v1423_v42 = vsel %vm1418_vm4, %v1415_v55, %v1417_v38  ;;  %1386 = vrot.lane.b32.xlu1 %v1366_v31, %s2516_s21  ;;  %1482 = vrot.lane.b32.xlu0 %v1434_v36, %s2511_s16  ;;  %v1437_v57 = vmax.f32 %v1366_v31, %v1417_v38  ;;  %vm1467_vm4 = vcmp.eq.s32.totalorder %v1458_v7, 1 }
 0x50e   :  { %v1436_v47 = vmax.f32 %v1345_v53, %v1423_v42 }
 0x511   :  { %1382 = vrot.lane.b32.xlu1 %v1344_v34, %s2516_s21  ;;  %1486 = vrot.lane.b32.xlu0 %v1436_v47, %s2511_s16 }
 0x515   :  { %1484 = vrot.lane.b32.xlu1 %v1435_v50, %s2511_s16  ;;  %1518 = vperm.xlu0 %2401, %v1512_v37  }
 0x519   :  { %1488 = vrot.lane.b32.xlu1 %v1437_v57, %s2511_s16  ;;  %1528 = vperm.xlu0 %2401, %v1514_v41  }
 0x51d   :  { %1523 = vperm.xlu1 %2507, %v1513_v61  }
 0x521   :  { %1533 = vperm.xlu1 %2507, %v1515_v22  }
 0x56a   :  { %v1375_v24 = vpop.permute.xlu0 %1374 }
 0x56e   :  { %v1477_v52 = vpop.permute.xlu1 %1476  ;;  %v1377_v51 = vpop.permute.xlu0 %1376 }
 0x56f   :  { %v1388_v59 = vsel %vm286_vm11, %v1375_v24, %v1377_v51 }
 0x570   :  { %v1400_v13 = vmax.f32 %v3265_v26, %v1388_v59  ;;  %v1509_v26 = vld [vmem:[%s3480_s6 + $0x8] sm:$0xff] }
 0x572   :  { %v1379_v18 = vpop.permute.xlu1 %1378 }
 0x573   :  { %v1389_v48 = vsel %vm286_vm11, %v1377_v51, %v1379_v18  ;;  %v1481_v46 = vpop.permute.xlu0 %1480 }
 0x574   :  { %v1401_v25 = vmax.f32 %v3275_v15, %v1389_v48 }
 0x576   :  { %v1479_v45 = vpop.permute.xlu1 %1478 }
 0x577   :  { %v1490_v63 = vsel %vm3523_vm1, %v1477_v52, %v1479_v45  ;;  %v1491_v3 = vsel %vm3524_vm9, %v1479_v45, %v1481_v46  ;;  %v1381_v54 = vpop.permute.xlu0 %1380 }
 0x578   :  { %v1503_v23 = vsel %vm1464_vm5, %v1401_v25, %v1491_v3  ;;  %v1502_v17 = vsel %vm1463_vm2, %v1400_v13, %v1490_v63  ;;  %v1390_v33 = vsel %vm286_vm11, %v1379_v18, %v1381_v54  ;;  %vm3528_vm5 = vmmov %vm3523_vm1 }
 0x579   :  { %1549 = vmatprep.subr.mxu0 %v1503_v23  ;;  %v1402_v8 = vmax.f32 %v3280_v11, %v1390_v33 }
 0x57a   :  { %1550 = vmatpush1.msra.mxu0 %v1502_v17 }
 0x57b   :  { %2161 = vmatmul.mubr.msk.f32.vlgmr.msra.gmra.mrb[8].mxu0 %vm1536_vm10, %v1508_v5  ;;  %v1385_v15 = vpop.permute.xlu0 %1384 }
 0x57c   :  { %1619 = vmatprep.mubr.f32.mxu0 %v2518_v20 }
 0x57f   :  { %2162 = vmatmul.mubr.msk.f32.gmra.mrb[10].mxu0 %vm1536_vm10, %v1509_v26  ;;  %v1387_v40 = vpop.permute.xlu1 %1386  ;;  %v1483_v56 = vpop.permute.xlu0 %1482 }
 0x580   :  { %1625 = vmatprep.mubr.f32.mxu0 %v2518_v20  ;;  %v1492_v4 = vsel %vm3525_vm15, %v1481_v46, %v1483_v56  ;;  %v1393_v34 = vsel %vm286_vm11, %v1385_v15, %v1387_v40 }
 0x581   :  { %v1504_v10 = vsel %vm1465_vm14, %v1402_v8, %v1492_v4  ;;  %v1405_v36 = vmax.f32 %v3305_v2, %v1393_v34 }
 0x583   :  { %2163 = vmatmul.mubr.msk.f32.gmra.mrb[12].mxu0 %vm1536_vm10, %v1510_v49  ;;  %v1383_v28 = vpop.permute.xlu1 %1382  ;;  %v1487_v58 = vpop.permute.xlu0 %1486 }
 0x584   :  { %1631 = vmatprep.mubr.f32.mxu0 %v2518_v20  ;;  %v1391_v27 = vsel %vm286_vm11, %v1381_v54, %v1383_v28  ;;  %v1392_v14 = vsel %vm286_vm11, %v1383_v28, %v1385_v15  ;;  %vm1841_vm11 = vcmask 261120  }
 0x585   :  { %v1403_v19 = vmax.f32 %v3295_v60, %v1391_v27  ;;  %v1404_v11 = vmax.f32 %v3303_v44, %v1392_v14 }
 0x587   :  { %2164 = vmatmul.mubr.msk.f32.gmra.mrb[14].mxu0 %vm1536_vm10, %v1511_v30  ;;  %v1485_v9 = vpop.permute.xlu1 %1484 }
 0x588   :  { %v1493_v53 = vsel %vm3526_vm6, %v1483_v56, %v1485_v9  ;;  %1791 = vmatprep.mubr.f32.mxu0 %v2518_v20  ;;  %v1494_v55 = vsel %vm3527_vm3, %v1485_v9, %v1487_v58  ;;  %v3440_v56 = vld [vmem:[%s3481_s8] sm:$0xf] }
 0x589   :  { %v1505_v60 = vsel %vm1466_vm12, %v1403_v19, %v1493_v53  ;;  %v1506_v42 = vsel %vm1467_vm4, %v1404_v11, %v1494_v55 }
 0x58a   :  { %1638 = vmatprep.subr.mxu1 %v1505_v60 }
 0x58b   :  { %v1489_v12 = vpop.permute.xlu1 %1488  ;;  %1639 = vmatpush1.msra.mxu1 %v1504_v10 }
 0x58c   :  { %v1495_v38 = vsel %vm3528_vm5, %v1487_v58, %v1489_v12  ;;  %2165 = vmatmul.mubr.msk.f32.vlgmr.msra.gmra.mrb[4].mxu1 %vm1536_vm10, %v1508_v5 }
 0x58d   :  { %v1507_v31 = vsel %vm1468_vm0, %v1405_v36, %v1495_v38  ;;  %1708 = vmatprep.mubr.f32.mxu1 %v2518_v20 }
 0x58e   :  { %1727 = vmatprep.subr.mxu0 %v1507_v31 }
 0x58f   :  { %1728 = vmatpush1.msra.mxu0 %v1506_v42 }
 0x590   :  { %2166 = vmatmul.mubr.msk.f32.gmra.mrb[6].mxu1 %vm1536_vm10, %v1509_v26  ;;  %2169 = vmatmul.mubr.msk.f32.vlgmr.msra.gmra.mrb[16].mxu0 %vm1536_vm10, %v1508_v5 }
 0x591   :  { %1714 = vmatprep.mubr.f32.mxu1 %v2518_v20  ;;  %1797 = vmatprep.mubr.f32.mxu0 %v2518_v20 }
 0x594   :  { %2167 = vmatmul.mubr.msk.f32.gmra.mrb[8].mxu1 %vm1536_vm10, %v1510_v49  ;;  %2170 = vmatmul.mubr.msk.f32.gmra.mrb[18].mxu0 %vm1536_vm10, %v1509_v26  ;;  %v1519_v47 = vpop.permute.xlu0 %1518 }
 0x595   :  { %1720 = vmatprep.mubr.f32.mxu1 %v2518_v20  ;;  %1803 = vmatprep.mubr.f32.mxu0 %v2518_v20 }
 0x598   :  { %2168 = vmatmul.mubr.msk.f32.gmra.mrb[10].mxu1 %vm1536_vm10, %v1511_v30  ;;  %2171 = vmatmul.mubr.msk.f32.gmra.mrb[20].mxu0 %vm1536_vm10, %v1510_v49  ;;  %v3429_v59 = vpop.permute.xlu0 %1528 }
 0x599   :  { %1809 = vmatprep.mubr.f32.mxu0 %v2518_v20  ;;  %1909 = vmatprep.mubr.f32.mxu1 %v2518_v20 }
 0x59c   :  { %2172 = vmatmul.mubr.msk.f32.gmra.mrb[22].mxu0 %vm1536_vm10, %v1511_v30  ;;  %v1524_v37 = vpop.permute.xlu1 %1523 }
 0x59d   :  { %1980 = vmatprep.mubr.f32.mxu0 %v2518_v20 }
 0x5a0   :  { %v3432_v13 = vpop.permute.xlu1 %1533 }
 0x64e   :  { %v1615_v44 = vpop.f32.mrb[8].mxu0 }
 0x64f   :  { %v1617_v2 = vpop.f32.mrb[9].mxu0  ;;  %v1616_v39 = vadd.f32 %v1615_v44, %v1519_v47 }
 0x650   :  { %v1618_v50 = vadd.f32 %v1617_v2, %v1519_v47 }
 0x651   :  { %v1816_v24 = vmax.f32 %v1616_v39, 0.0 }
 0x652   :  { %v1621_v41 = vpop.f32.mrb[10].mxu0  ;;  %v1817_v52 = vmax.f32 %v1618_v50, 0.0 }
 0x653   :  { %v1622_v57 = vadd.f32 %v1621_v41, %v1524_v37  ;;  %v1623_v61 = vpop.f32.mrb[11].mxu0 }
 0x654   :  { %v1624_v22 = vadd.f32 %v1623_v61, %v1524_v37 }
 0x655   :  { %v1822_v32 = vmax.f32 %v1622_v57, 0.0 }
 0x656   :  { %v1823_v51 = vmax.f32 %v1624_v22, 0.0  ;;  %v1627_v16 = vpop.f32.mrb[12].mxu0 }
 0x657   :  { %v2244_v0 = vpack.c.bf16 %v1822_v32, %v1816_v24  ;;  %v1629_v18 = vpop.f32.mrb[13].mxu0  ;;  %v1628_v46 = vadd.f32 %v1627_v16, %v3429_v59 }
 0x658   :  { %v2242_v48 = vpack.c.bf16 %v1823_v51, %v1817_v52  ;;  %v1630_v25 = vadd.f32 %v1629_v18, %v3429_v59 }
 0x659   :  { %v1828_v17 = vmax.f32 %v1628_v46, 0.0 }
 0x65a   :  { %v1633_v45 = vpop.f32.mrb[14].mxu0  ;;  %2243 = vmatprep.subr.bf16.mxu1 %v2242_v48  ;;  %v1829_v54 = vmax.f32 %v1630_v25, 0.0 }
 0x65b   :  { %v1634_v63 = vadd.f32 %v1633_v45, %v3432_v13  ;;  %v1635_v3 = vpop.f32.mrb[15].mxu0  ;;  %2245 = vmatpush1.bf16.msra.mxu1 %v2244_v0 }
 0x65c   :  { %v1636_v23 = vadd.f32 %v1635_v3, %v3432_v13 }
 0x65d   :  { %v1834_v5 = vmax.f32 %v1634_v63, 0.0 }
 0x65e   :  { %v1835_v26 = vmax.f32 %v1636_v23, 0.0 }
 0x65f   :  { %v2248_v15 = vpack.c.bf16 %v1834_v5, %v1828_v17  ;;  %v1704_v40 = vpop.f32.mrb[4].mxu1 }
 0x660   :  { %v2246_v49 = vpack.c.bf16 %v1835_v26, %v1829_v54  ;;  %v1706_v21 = vpop.f32.mrb[5].mxu1  ;;  %v1705_v28 = vadd.f32 %v1704_v40, %v1519_v47 }
 0x661   :  { %v1707_v29 = vadd.f32 %v1706_v21, %v1519_v47 }
 0x662   :  { %2247 = vmatprep.subr.bf16.mxu1 %v2246_v49  ;;  %v1818_v9 = vmax.f32 %v1705_v28, 0.0 }
 0x663   :  { %2249 = vmatpush1.bf16.msra.mxu1 %v2248_v15  ;;  %v1710_v27 = vpop.f32.mrb[6].mxu1  ;;  %v1793_v30 = vpop.f32.mrb[16].mxu0  ;;  %v1819_v34 = vmax.f32 %v1707_v29, 0.0 }
 0x664   :  { %v1711_v33 = vadd.f32 %v1710_v27, %v1524_v37  ;;  %v1712_v6 = vpop.f32.mrb[7].mxu1  ;;  %v1795_v19 = vpop.f32.mrb[17].mxu0  ;;  %v1794_v8 = vadd.f32 %v1793_v30, %v1519_v47 }
 0x665   :  { %v1713_v4 = vadd.f32 %v1712_v6, %v1524_v37  ;;  %v1796_v14 = vadd.f32 %v1795_v19, %v1519_v47 }
 0x666   :  { %v1824_v7 = vmax.f32 %v1711_v33, 0.0  ;;  %2173 = vmatmul.mubr.msk.f32.vlgmr.msra.gmra.mrb[12].mxu1 %vm1841_vm11, %v3440_v56  ;;  %v1820_v31 = vmax.f32 %v1794_v8, 0.0 }
 0x667   :  { %v1825_v53 = vmax.f32 %v1713_v4, 0.0  ;;  %v1716_v60 = vpop.f32.mrb[8].mxu1  ;;  %v1799_v58 = vpop.f32.mrb[18].mxu0  ;;  %2051 = vmatprep.mubr.f32.mxu1 %v2518_v20  ;;  %v1821_v2 = vmax.f32 %v1796_v14, 0.0 }
 0x668   :  { %v2252_v10 = vpack.c.bf16 %v1824_v7, %v1818_v9  ;;  %v1800_v36 = vadd.f32 %v1799_v58, %v1524_v37  ;;  %v1718_v55 = vpop.f32.mrb[9].mxu1  ;;  %v1801_v12 = vpop.f32.mrb[19].mxu0  ;;  %v1717_v42 = vadd.f32 %v1716_v60, %v3429_v59 }
 0x669   :  { %v2250_v11 = vpack.c.bf16 %v1825_v53, %v1819_v34  ;;  %v1802_v38 = vadd.f32 %v1801_v12, %v1524_v37  ;;  %v1719_v39 = vadd.f32 %v1718_v55, %v3429_v59 }
 0x66a   :  { %v1826_v44 = vmax.f32 %v1800_v36, 0.0  ;;  %v1830_v32 = vmax.f32 %v1717_v42, 0.0 }
 0x66b   :  { %v1827_v50 = vmax.f32 %v1802_v38, 0.0  ;;  %v1722_v41 = vpop.f32.mrb[10].mxu1  ;;  %v1805_v47 = vpop.f32.mrb[20].mxu0  ;;  %2251 = vmatprep.subr.bf16.mxu0 %v2250_v11  ;;  %v1831_v16 = vmax.f32 %v1719_v39, 0.0 }
 0x66c   :  { %v2260_v57 = vpack.c.bf16 %v1826_v44, %v1820_v31  ;;  %v1723_v20 = vadd.f32 %v1722_v41, %v3432_v13  ;;  %v1724_v61 = vpop.f32.mrb[11].mxu1  ;;  %v1807_v22 = vpop.f32.mrb[21].mxu0  ;;  %2253 = vmatpush1.bf16.msra.mxu0 %v2252_v10  ;;  %v1806_v51 = vadd.f32 %v1805_v47, %v3429_v59  ;;  %v2132_v31 = vstv %s3482_s9 }
 0x66d   :  { %v2258_v24 = vpack.c.bf16 %v1827_v50, %v1821_v2  ;;  %v1725_v37 = vadd.f32 %v1724_v61, %v3432_v13  ;;  %v1808_v18 = vadd.f32 %v1807_v22, %v3429_v59  ;;  %v3529_v47 = vlaneseq }
 0x66e   :  { %v1836_v52 = vmax.f32 %v1723_v20, 0.0  ;;  %v1832_v23 = vmax.f32 %v1806_v51, 0.0 }
 0x66f   :  { %v1837_v0 = vmax.f32 %v1725_v37, 0.0  ;;  %v1811_v48 = vpop.f32.mrb[22].mxu0  ;;  %2259 = vmatprep.subr.bf16.mxu1 %v2258_v24  ;;  %v1833_v5 = vmax.f32 %v1808_v18, 0.0  ;;  %vm2140_vm2 = vcmp.lt.s32.totalorder %v3529_v47, 768 }
 0x670   :  { %v2256_v46 = vpack.c.bf16 %v1836_v52, %v1830_v32  ;;  %v1812_v25 = vadd.f32 %v1811_v48, %v3432_v13  ;;  %v1813_v45 = vpop.f32.mrb[23].mxu0  ;;  %2261 = vmatpush1.bf16.msra.mxu1 %v2260_v57 }
 0x671   :  { %v2254_v63 = vpack.c.bf16 %v1837_v0, %v1831_v16  ;;  %v1814_v3 = vadd.f32 %v1813_v45, %v3432_v13  ;;  %v2524_v13 = vmov 1966171168  }
 0x672   :  { %v1838_v17 = vmax.f32 %v1812_v25, 0.0  ;;  %v2068_v21 = vunpack.c.l.s4 %v2524_v13 }
 0x673   :  { %v1839_v54 = vmax.f32 %v1814_v3, 0.0  ;;  %2255 = vmatprep.subr.bf16.mxu0 %v2254_v63 }
 0x674   :  { %v2264_v26 = vpack.c.bf16 %v1838_v17, %v1832_v23  ;;  %2257 = vmatpush1.bf16.msra.mxu0 %v2256_v46  ;;  %v2069_v28 = vunpack.c.0.s8 %v2068_v21 }
 0x675   :  { %v2262_v15 = vpack.c.bf16 %v1839_v54, %v1833_v5 }
 0x676   :  { %v2072_v29 = vsub.s32 %v2069_v28, %v2581_v1 }
 0x677   :  { %2263 = vmatprep.subr.bf16.mxu1 %v2262_v15  ;;  %2174 = vmatmul.mubr.msk.f32.vlgmr.msra.gmra.mrb[24].mxu0 %vm1841_vm11, %v3440_v56 }
 0x678   :  { %2265 = vmatpush1.bf16.msra.mxu1 %v2264_v26 }
 0x67b   :  { %2175 = vmatmul.mubr.msk.f32.vlgmr.msra.gmra.mrb[14].mxu1 %vm1841_vm11, %v3440_v56 }
 0x739   :  { %v1911_v59 = vpop.f32.mrb[12].mxu1 }
 0x73a   :  { %v1913_v40 = vpop.f32.mrb[13].mxu1 }
 0x73b   :  { %v2064_v49 = vcombine.low %v1911_v59, %v1913_v40 }
 0x73d   :  { %v2073_v6 = vrot.slane %v2064_v49, %v2072_v29 }
 0x74a   :  { %v1982_v27 = vpop.f32.mrb[24].mxu0 }
 0x74b   :  { %v1984_v30 = vpop.f32.mrb[25].mxu0 }
 0x74c   :  { %v2065_v33 = vcombine.low %v1982_v27, %v1984_v30 }
 0x74e   :  { %v2053_v19 = vpop.f32.mrb[14].mxu1  ;;  %v2080_v4 = vrot.slane %v2065_v33, %v2072_v29 }
 0x74f   :  { %v2055_v9 = vpop.f32.mrb[15].mxu1 }
 0x750   :  { %v2088_v7 = vcombine.low %v2073_v6, %v2080_v4  ;;  %v2105_v8 = vcombine.high %v2073_v6, %v2080_v4  ;;  %v2066_v34 = vcombine.low %v2053_v19, %v2055_v9 }
 0x752   :  { %v2087_v53 = vrot.slane %v2066_v34, %v2072_v29  ;;  %v2095_v56 = vrot.slane %v2088_v7, %v2072_v29  ;;  %v2113_v58 = vrot.slane %v2105_v8, %v2072_v29 }
 0x754   :  { %v2102_v14 = vrot.slane %v2087_v53, %v2072_v29  ;;  %v2106_v60 = vcombine.high %v2087_v53, %v2087_v53 }
 0x756   :  { %v2103_v10 = vcombine.low %v2095_v56, %v2102_v14  ;;  %v2120_v36 = vrot.slane %v2106_v60, %v2072_v29  ;;  %v2124_v55 = vcombine.high %v2095_v56, %v2102_v14 }
 0x758   :  { %v2121_v12 = vcombine.low %v2113_v58, %v2120_v36  ;;  %v2126_v1 = vcombine.high %v2113_v58, %v2120_v36 }
 0x75a   :  { %v2123_v11 = vsel %vm43_vm13, %v2103_v10, %v2121_v12  ;;  %v2128_v38 = vsel %vm43_vm13, %v2124_v55, %v2126_v1 }
 0x75b   :  { %v2129_v42 = vsel %vm40_vm7, %v2123_v11, %v2128_v38 }
 0x75c   :  { %v2130_v44 = vsel %vm37_vm8, %v2129_v42, 0.0 }
 0x75d   :  { %v2133_v2 = vadd.f32 %v2132_v31, %v2130_v44 }
 0x75f   :  { %v2134_v39 = vmul.f32 0.5, %v2133_v2 }
 0x761   :  { %2508 = vtanh.f32 %v2134_v39 }
 0x76b   :  { %v2509_v50 = vpop.eup %2508 }
 0x76c   :  { %v2136_v41 = vmul.f32 0.5, %v2509_v50 }
 0x76e   :  { %v2137_v57 = vadd.f32 0.5, %v2136_v41 }
 0x770   :  { %2142 = vst.msk [vmem:[%s3483_s10] sm:$0x3f] %vm2140_vm2, %v2137_v57 }

</bundles_post_ra>
